<compile_context>
chip_gen: v5e
topology: v5e:2x2
jax: 0.10.0
libtpu: 0.0.40
codegen_flags: <defaults>
</compile_context>

<pallas_src>
import jax
import jax.numpy as jnp
from jax.experimental import pallas as pl
from jax.experimental.pallas import tpu as pltpu

KH = KW = 3  # module defaults: kernel_size=3, stride=1, padding=1


def conv_stats_kernel(x_ref, w_ref, conv_ref, stats_ref):
    """One image per grid step: fused 3x3 conv (single matmul) + partial BN stats.

    x_ref:     (1, H+2, W+2, Cin)   bf16 padded input (NHWC)
    w_ref:     (Cout, KH*KW*Cin)    bf16 im2col-ordered weights
    conv_ref:  (1, Cout, H*W)       f32 lane-dense conv output
    stats_ref: (1, Cout, 2)         f32 per-image [sum, sumsq] over (H, W)
    """
    _, Hp, Wp, Cin = x_ref.shape
    Cout, _ = w_ref.shape
    H = Hp - KH + 1
    W = Wp - KW + 1

    x = x_ref[0]  # (Hp, Wp, Cin), bf16

    # shift-and-stack im2col: build (H*W, KH*KW*Cin) once, then a single
    # large-K MXU matmul instead of 9 tiny K=Cin matmuls.
    taps = []
    for kh in range(KH):                 # static 3x3 loop, unrolled at trace time
        for kw in range(KW):
            taps.append(x[kh:kh + H, kw:kw + W, :].reshape(H * W, Cin))
    patches = jnp.concatenate(taps, axis=-1)          # (H*W, KH*KW*Cin) bf16

    # (Cout, K) x (H*W, K)^T -> (Cout, H*W); f32 accumulation on the MXU.
    acc = jax.lax.dot_general(
        w_ref[...], patches,
        (((1,), (1,)), ((), ())),
        preferred_element_type=jnp.float32)           # (Cout, H*W) f32

    # partial batch-norm statistics for this image (reduced across the grid
    # in the wrapper -- BN stats must span the full (N, H, W) extent).
    s = jnp.sum(acc, axis=1, keepdims=True)           # (Cout, 1)
    ss = jnp.sum(acc * acc, axis=1, keepdims=True)    # (Cout, 1)
    stats_ref[...] = jnp.concatenate([s, ss], axis=1)[None]   # (1, Cout, 2)

    # lane-dense store: last dim = H*W (256) -> unmasked vst
    conv_ref[...] = acc[None]


def bn_relu_kernel(conv_ref, scale_ref, shift_ref, o_ref):
    """Fused affine BN + ReLU (all f32 vector math; single VPU pass).

    conv_ref:  (1, Cout, H*W) f32
    scale_ref: (Cout, 1)      f32   gamma * rsqrt(var + eps)
    shift_ref: (Cout, 1)      f32   beta - mean * scale
    o_ref:     (1, Cout, H*W) f32
    """
    y = conv_ref[...] * scale_ref[...] + shift_ref[...]
    o_ref[...] = jnp.maximum(y, 0.0)


def conv_block(x_nchw, w_oihw, bias, gamma, beta, eps=1e-5):
    """ConvBlock.forward (training-mode BN): NCHW in / NCHW out."""
    N, Cin, H, W = x_nchw.shape
    Cout = w_oihw.shape[0]
    Hp, Wp = H + 2, W + 2
    K = KH * KW * Cin

    # ---- layout glue (outside the kernels) ----
    # bf16 inputs feed the MXU at its bf16 rate and halve DMA bytes; all
    # accumulation and BN math stays f32 (safe on v5e as well).
    x = jnp.transpose(x_nchw, (0, 2, 3, 1)).astype(jnp.bfloat16)        # NHWC
    x_pad = jnp.pad(x, ((0, 0), (1, 1), (1, 1), (0, 0)))                # (N,Hp,Wp,Cin)
    # im2col-ordered weights: (Cout, Cin, KH, KW) -> (Cout, KH*KW*Cin)
    w2 = jnp.transpose(w_oihw, (0, 2, 3, 1)).astype(jnp.bfloat16).reshape(Cout, K)
    # NOTE: the conv bias is exactly cancelled by the training-mode BN mean
    # subtraction, so it is (correctly) never added.
    del bias

    cparams = pltpu.CompilerParams(
        dimension_semantics=("parallel",),   # shard the batch grid across TCs (v7x)
        vmem_limit_bytes=32 * 1024 * 1024,   # explicit budget, safe on v5e/v6e/v7x
    )
    # NOTE: for realistic sizes, keep Cin/Cout multiples of 128 and add H-row
    # tiling (with a 2-row halo) to this grid; for the toy 16x16 image the
    # per-image block is tiny and the batch grid already double-buffers HBM<->VMEM.

    # ---- pass 1: conv (single large-K matmul) + per-image partial BN stats ----
    conv_out, stats = pl.pallas_call(
        conv_stats_kernel,
        out_shape=(
            jax.ShapeDtypeStruct((N, Cout, H * W), jnp.float32),
            jax.ShapeDtypeStruct((N, Cout, 2), jnp.float32),
        ),
        grid=(N,),
        in_specs=[
            pl.BlockSpec((1, Hp, Wp, Cin), lambda n: (n, 0, 0, 0)),
            pl.BlockSpec((Cout, K), lambda n: (0, 0)),
        ],
        out_specs=(
            pl.BlockSpec((1, Cout, H * W), lambda n: (n, 0, 0)),
            pl.BlockSpec((1, Cout, 2), lambda n: (n, 0, 0)),
        ),
        compiler_params=cparams,
    )(x_pad, w2)

    # ---- cross-tile BN reduction, folded into a single per-channel affine ----
    count = N * H * W
    mean = jnp.sum(stats[:, :, 0], axis=0) / count                     # (Cout,)
    var = jnp.sum(stats[:, :, 1], axis=0) / count - mean * mean        # biased var
    inv_std = jax.lax.rsqrt(var + eps)
    scale = gamma.astype(jnp.float32) * inv_std                        # (Cout,)
    shift = beta.astype(jnp.float32) - mean * scale                    # (Cout,)
    # TODO(synk): PyTorch BatchNorm2d in training mode also updates
    # running_mean/running_var buffers; those side effects are not returned here.
    scale2 = scale.reshape(Cout, 1)
    shift2 = shift.reshape(Cout, 1)

    # ---- pass 2: fused normalize + ReLU, fully lane-dense and pipelined ----
    out_flat = pl.pallas_call(
        bn_relu_kernel,
        out_shape=jax.ShapeDtypeStruct((N, Cout, H * W), jnp.float32),
        grid=(N,),
        in_specs=[
            pl.BlockSpec((1, Cout, H * W), lambda n: (n, 0, 0)),
            pl.BlockSpec((Cout, 1), lambda n: (0, 0)),
            pl.BlockSpec((Cout, 1), lambda n: (0, 0)),
        ],
        out_specs=pl.BlockSpec((1, Cout, H * W), lambda n: (n, 0, 0)),
        compiler_params=cparams,
    )(conv_out, scale2, shift2)

    # free reshape back to NCHW (no transpose needed)
    return out_flat.reshape(N, Cout, H, W)


def reference_conv_block(x, w, b, gamma, beta, eps=1e-5):
    """Pure-JAX f32 reference of the PyTorch module (training-mode BN)."""
    y = jax.lax.conv_general_dilated(
        x, w, window_strides=(1, 1), padding=((1, 1), (1, 1)),
        dimension_numbers=("NCHW", "OIHW", "NCHW"))
    y = y + b[None, :, None, None]
    mean = jnp.mean(y, axis=(0, 2, 3), keepdims=True)
    var = jnp.mean((y - mean) ** 2, axis=(0, 2, 3), keepdims=True)
    y = gamma[None, :, None, None] * (y - mean) * jax.lax.rsqrt(var + eps) \
        + beta[None, :, None, None]
    return jnp.maximum(y, 0.0)


if __name__ == "__main__":
    key = jax.random.PRNGKey(0)
    k_x, k_w, k_b = jax.random.split(key, 3)

    N, Cin, Cout, H, W = 2, 4, 8, 16, 16
    x = jax.random.normal(k_x, (N, Cin, H, W), dtype=jnp.float32)

    # Deterministic parameters (shapes match nn.Conv2d / nn.BatchNorm2d defaults)
    fan_in = Cin * KH * KW
    bound = 1.0 / (fan_in ** 0.5)
    w = jax.random.uniform(k_w, (Cout, Cin, KH, KW), jnp.float32, -bound, bound)
    b = jax.random.uniform(k_b, (Cout,), jnp.float32, -bound, bound)
    gamma = jnp.ones((Cout,), jnp.float32)   # BN weight default
    beta = jnp.zeros((Cout,), jnp.float32)   # BN bias default

    run = jax.jit(conv_block)
    out = run(x, w, b, gamma, beta)
    jax.block_until_ready(out)
    assert out.shape == (N, Cout, H, W)

    # correctness check vs pure-JAX f32 reference (loose tol: kernel feeds bf16 to the MXU)
    ref = reference_conv_block(x, w, b, gamma, beta)
    err = float(jnp.max(jnp.abs(out - ref)))
    assert err < 0.1, f"max abs err {err}"

    print("KERNEL_OK")
</pallas_src>

<mosaic_0001>
module attributes {stable_mosaic.version = 11 : i64} {
  func.func @conv_stats_kernel(%arg0: i32, %arg1: memref<1x18x18x4xbf16, #tpu.memory_space<vmem>>, %arg2: memref<8x36xbf16, #tpu.memory_space<vmem>>, %arg3: memref<1x8x256xf32, #tpu.memory_space<vmem>>, %arg4: memref<1x8x2xf32, #tpu.memory_space<vmem>>) attributes {dimension_semantics = [#tpu.dimension_semantics<parallel>], iteration_bounds = array<i64: 2>, scalar_prefetch = 0 : i64, scratch_operands = 0 : i64, tpu.core_type = #tpu.core_type<tc>, window_params = [{transform_indices = @transform_0, window_bounds = array<i64: 1, 18, 18, 4>}, {pipeline_mode = #tpu.pipeline_mode<synchronous>, transform_indices = @transform_1, window_bounds = array<i64: 8, 36>}, {transform_indices = @transform_2, window_bounds = array<i64: 1, 8, 256>}, {transform_indices = @transform_3, window_bounds = array<i64: 1, 8, 2>}]} {
    %c0 = arith.constant 0 : index
    %c0_0 = arith.constant 0 : index
    %c0_1 = arith.constant 0 : index
    %c0_2 = arith.constant 0 : index
    %0 = vector.load %arg1[%c0, %c0_0, %c0_1, %c0_2] : memref<1x18x18x4xbf16, #tpu.memory_space<vmem>>, vector<1x18x18x4xbf16>
    %1 = vector.shape_cast %0 : vector<1x18x18x4xbf16> to vector<18x18x4xbf16>
    %2 = vector.extract_strided_slice %1 {offsets = [0, 0, 0], sizes = [16, 16, 4], strides = [1, 1, 1]} : vector<18x18x4xbf16> to vector<16x16x4xbf16>
    %3 = vector.shape_cast %2 : vector<16x16x4xbf16> to vector<256x4xbf16>
    %4 = vector.extract_strided_slice %1 {offsets = [0, 1, 0], sizes = [16, 16, 4], strides = [1, 1, 1]} : vector<18x18x4xbf16> to vector<16x16x4xbf16>
    %5 = vector.shape_cast %4 : vector<16x16x4xbf16> to vector<256x4xbf16>
    %6 = vector.extract_strided_slice %1 {offsets = [0, 2, 0], sizes = [16, 16, 4], strides = [1, 1, 1]} : vector<18x18x4xbf16> to vector<16x16x4xbf16>
    %7 = vector.shape_cast %6 : vector<16x16x4xbf16> to vector<256x4xbf16>
    %8 = vector.extract_strided_slice %1 {offsets = [1, 0, 0], sizes = [16, 16, 4], strides = [1, 1, 1]} : vector<18x18x4xbf16> to vector<16x16x4xbf16>
    %9 = vector.shape_cast %8 : vector<16x16x4xbf16> to vector<256x4xbf16>
    %10 = vector.extract_strided_slice %1 {offsets = [1, 1, 0], sizes = [16, 16, 4], strides = [1, 1, 1]} : vector<18x18x4xbf16> to vector<16x16x4xbf16>
    %11 = vector.shape_cast %10 : vector<16x16x4xbf16> to vector<256x4xbf16>
    %12 = vector.extract_strided_slice %1 {offsets = [1, 2, 0], sizes = [16, 16, 4], strides = [1, 1, 1]} : vector<18x18x4xbf16> to vector<16x16x4xbf16>
    %13 = vector.shape_cast %12 : vector<16x16x4xbf16> to vector<256x4xbf16>
    %14 = vector.extract_strided_slice %1 {offsets = [2, 0, 0], sizes = [16, 16, 4], strides = [1, 1, 1]} : vector<18x18x4xbf16> to vector<16x16x4xbf16>
    %15 = vector.shape_cast %14 : vector<16x16x4xbf16> to vector<256x4xbf16>
    %16 = vector.extract_strided_slice %1 {offsets = [2, 1, 0], sizes = [16, 16, 4], strides = [1, 1, 1]} : vector<18x18x4xbf16> to vector<16x16x4xbf16>
    %17 = vector.shape_cast %16 : vector<16x16x4xbf16> to vector<256x4xbf16>
    %18 = vector.extract_strided_slice %1 {offsets = [2, 2, 0], sizes = [16, 16, 4], strides = [1, 1, 1]} : vector<18x18x4xbf16> to vector<16x16x4xbf16>
    %19 = vector.shape_cast %18 : vector<16x16x4xbf16> to vector<256x4xbf16>
    %20 = tpu.concatenate %3, %5, %7, %9, %11, %13, %15, %17, %19 in 1 : vector<256x4xbf16>, vector<256x4xbf16>, vector<256x4xbf16>, vector<256x4xbf16>, vector<256x4xbf16>, vector<256x4xbf16>, vector<256x4xbf16>, vector<256x4xbf16>, vector<256x4xbf16> -> vector<256x36xbf16>
    %c0_3 = arith.constant 0 : index
    %c0_4 = arith.constant 0 : index
    %21 = vector.load %arg2[%c0_3, %c0_4] : memref<8x36xbf16, #tpu.memory_space<vmem>>, vector<8x36xbf16>
    %cst = arith.constant dense<0.000000e+00> : vector<8x256xf32>
    %22 = tpu.matmul %21, %20, %cst {dimension_numbers = #tpu.dot_dimension_numbers<[1], [1], [0], [0], [0, 0, 1, 0], [], []>} : vector<8x36xbf16>, vector<256x36xbf16>, vector<8x256xf32> -> vector<8x256xf32>
    %cst_5 = arith.constant dense<0.000000e+00> : vector<8xf32>
    %23 = vector.multi_reduction <add>, %22, %cst_5 [1] : vector<8x256xf32> to vector<8xf32>
    %24 = vector.shape_cast %23 : vector<8xf32> to vector<8x1xf32>
    %25 = arith.mulf %22, %22 : vector<8x256xf32>
    %cst_6 = arith.constant dense<0.000000e+00> : vector<8xf32>
    %26 = vector.multi_reduction <add>, %25, %cst_6 [1] : vector<8x256xf32> to vector<8xf32>
    %27 = vector.shape_cast %26 : vector<8xf32> to vector<8x1xf32>
    %28 = tpu.concatenate %24, %27 in 1 : vector<8x1xf32>, vector<8x1xf32> -> vector<8x2xf32>
    %29 = vector.shape_cast %28 : vector<8x2xf32> to vector<1x8x2xf32>
    %c0_7 = arith.constant 0 : index
    %c0_8 = arith.constant 0 : index
    %c0_9 = arith.constant 0 : index
    %30 = vector.load %arg4[%c0_7, %c0_8, %c0_9] : memref<1x8x2xf32, #tpu.memory_space<vmem>>, vector<1x8x2xf32>
    tpu.vector_store %arg4[%c0_7, %c0_8, %c0_9], %29 {strides = array<i32>} : memref<1x8x2xf32, #tpu.memory_space<vmem>>, vector<1x8x2xf32>,
    %31 = vector.shape_cast %22 : vector<8x256xf32> to vector<1x8x256xf32>
    %c0_10 = arith.constant 0 : index
    %c0_11 = arith.constant 0 : index
    %c0_12 = arith.constant 0 : index
    %32 = vector.load %arg3[%c0_10, %c0_11, %c0_12] : memref<1x8x256xf32, #tpu.memory_space<vmem>>, vector<1x8x256xf32>
    tpu.vector_store %arg3[%c0_10, %c0_11, %c0_12], %31 {strides = array<i32>} : memref<1x8x256xf32, #tpu.memory_space<vmem>>, vector<1x8x256xf32>,
    return
  }
  func.func @transform_0(%arg0: i32) -> (i32, i32, i32, i32) {
    %c0_i32 = arith.constant 0 : i32
    %c0_i32_0 = arith.constant 0 : i32
    %c0_i32_1 = arith.constant 0 : i32
    %c0_i32_2 = arith.constant 0 : i32
    return %arg0, %c0_i32, %c0_i32_0, %c0_i32_1 : i32, i32, i32, i32
  }
  func.func @transform_1(%arg0: i32) -> (i32, i32) {
    %c0_i32 = arith.constant 0 : i32
    %c0_i32_0 = arith.constant 0 : i32
    %c0_i32_1 = arith.constant 0 : i32
    return %c0_i32, %c0_i32_0 : i32, i32
  }
  func.func @transform_2(%arg0: i32) -> (i32, i32, i32) {
    %c0_i32 = arith.constant 0 : i32
    %c0_i32_0 = arith.constant 0 : i32
    %c0_i32_1 = arith.constant 0 : i32
    return %arg0, %c0_i32, %c0_i32_0 : i32, i32, i32
  }
  func.func @transform_3(%arg0: i32) -> (i32, i32, i32) {
    %c0_i32 = arith.constant 0 : i32
    %c0_i32_0 = arith.constant 0 : i32
    %c0_i32_1 = arith.constant 0 : i32
    return %arg0, %c0_i32, %c0_i32_0 : i32, i32, i32
  }
}

module attributes {stable_mosaic.version = 11 : i64} {
  func.func @bn_relu_kernel(%arg0: i32, %arg1: memref<1x8x256xf32, #tpu.memory_space<vmem>>, %arg2: memref<8x1xf32, #tpu.memory_space<vmem>>, %arg3: memref<8x1xf32, #tpu.memory_space<vmem>>, %arg4: memref<1x8x256xf32, #tpu.memory_space<vmem>>) attributes {dimension_semantics = [#tpu.dimension_semantics<parallel>], iteration_bounds = array<i64: 2>, scalar_prefetch = 0 : i64, scratch_operands = 0 : i64, tpu.core_type = #tpu.core_type<tc>, window_params = [{transform_indices = @transform_0, window_bounds = array<i64: 1, 8, 256>}, {pipeline_mode = #tpu.pipeline_mode<synchronous>, transform_indices = @transform_1, window_bounds = array<i64: 8, 1>}, {pipeline_mode = #tpu.pipeline_mode<synchronous>, transform_indices = @transform_2, window_bounds = array<i64: 8, 1>}, {transform_indices = @transform_3, window_bounds = array<i64: 1, 8, 256>}]} {
    %c0 = arith.constant 0 : index
    %c0_0 = arith.constant 0 : index
    %c0_1 = arith.constant 0 : index
    %0 = vector.load %arg1[%c0, %c0_0, %c0_1] : memref<1x8x256xf32, #tpu.memory_space<vmem>>, vector<1x8x256xf32>
    %c0_2 = arith.constant 0 : index
    %c0_3 = arith.constant 0 : index
    %1 = vector.load %arg2[%c0_2, %c0_3] : memref<8x1xf32, #tpu.memory_space<vmem>>, vector<8x1xf32>
    %2 = vector.shape_cast %1 : vector<8x1xf32> to vector<1x8x1xf32>
    %3 = vector.broadcast %2 : vector<1x8x1xf32> to vector<1x8x256xf32>
    %4 = arith.mulf %0, %3 : vector<1x8x256xf32>
    %c0_4 = arith.constant 0 : index
    %c0_5 = arith.constant 0 : index
    %5 = vector.load %arg3[%c0_4, %c0_5] : memref<8x1xf32, #tpu.memory_space<vmem>>, vector<8x1xf32>
    %6 = vector.shape_cast %5 : vector<8x1xf32> to vector<1x8x1xf32>
    %7 = vector.broadcast %6 : vector<1x8x1xf32> to vector<1x8x256xf32>
    %8 = arith.addf %4, %7 : vector<1x8x256xf32>
    %cst = arith.constant 0.000000e+00 : f32
    %9 = vector.broadcast %cst : f32 to vector<1x8x256xf32>
    %10 = arith.maximumf %8, %9 : vector<1x8x256xf32>
    %c0_6 = arith.constant 0 : index
    %c0_7 = arith.constant 0 : index
    %c0_8 = arith.constant 0 : index
    %11 = vector.load %arg4[%c0_6, %c0_7, %c0_8] : memref<1x8x256xf32, #tpu.memory_space<vmem>>, vector<1x8x256xf32>
    tpu.vector_store %arg4[%c0_6, %c0_7, %c0_8], %10 {strides = array<i32>} : memref<1x8x256xf32, #tpu.memory_space<vmem>>, vector<1x8x256xf32>,
    return
  }
  func.func @transform_0(%arg0: i32) -> (i32, i32, i32) {
    %c0_i32 = arith.constant 0 : i32
    %c0_i32_0 = arith.constant 0 : i32
    %c0_i32_1 = arith.constant 0 : i32
    return %arg0, %c0_i32, %c0_i32_0 : i32, i32, i32
  }
  func.func @transform_1(%arg0: i32) -> (i32, i32) {
    %c0_i32 = arith.constant 0 : i32
    %c0_i32_0 = arith.constant 0 : i32
    %c0_i32_1 = arith.constant 0 : i32
    return %c0_i32, %c0_i32_0 : i32, i32
  }
  func.func @transform_2(%arg0: i32) -> (i32, i32) {
    %c0_i32 = arith.constant 0 : i32
    %c0_i32_0 = arith.constant 0 : i32
    %c0_i32_1 = arith.constant 0 : i32
    return %c0_i32, %c0_i32_0 : i32, i32
  }
  func.func @transform_3(%arg0: i32) -> (i32, i32, i32) {
    %c0_i32 = arith.constant 0 : i32
    %c0_i32_0 = arith.constant 0 : i32
    %c0_i32_1 = arith.constant 0 : i32
    return %arg0, %c0_i32, %c0_i32_0 : i32, i32, i32
  }
}

</mosaic_0001>

<bundles_post_ra>
// kernel: conv_block.3
= control target key start
LH: loop header
LB: loop body
LE: loop exit
PB: predicated region body
PF: predicated region fallthrough
CT: control target
= control target key end

     0   :  { %s300_s12 = smov 0   ;;  %s323_s0 = inlined_call_operand.vmem [shape: f32[2,8,256], index: 0, kind: input, shape index: {}]   ;;  %s324_s1 = inlined_call_operand.vmem [shape: f32[8,1], index: 1, kind: input, shape index: {}]   ;;  %s325_s2 = inlined_call_operand.vmem [shape: f32[8,1], index: 2, kind: input, shape index: {}]   ;;  %s326_s3 = inlined_call_operand.vmem [shape: f32[2,8,256], index: 3, kind: output, shape index: {}]  }
   0x1 LB: > { %s248_s13 = sadd.s32 4294967295, %s277_s12   ;;  %p252_p0 = scmp.ge.s32.totalorder %s277_s12, 1  ;;  %s277_s12 = sphi %s300_s12, %s13_s12  }
   0x2   : > { %p137_p1 = scmp.lt.s32.totalorder %s277_s12, 3 }
   0x4   : > { %p138_p2 = pnand %p252_p0, %p137_p1 }
   0x5   : > { %p161_p3 = scmp.lt.s32.totalorder (!%p138_p2), %s248_s13, 1 }
   0x6   : > { %141 = sbr.rel (%p138_p2) target bundleno = 142 (0x8e), region = 32 }
   0xb   : > { %v173_v0 = vld [vmem:[%s324_s1] sm:$0xff]  ;;  %v279_v1 = vmov 0   ;;  %s328_s13 = smov (!%p161_p3, %s248_s13), 1 }
   0xc   : > { %270 = vset.pattern.permute.xlu0 %v279_v1  ;;  %v181_v2 = vld [vmem:[%s325_s2] sm:$0xff]  ;;  %s259_s18 = sshll.u32 %s328_s13, 4 }
   0xd   : > { %176 = vperm.xlu0 %270, %v173_v0   ;;  %s165_s21 = scalar_lea.vmem %s323_s0, %s259_s18  ;;  %s170_s24 = scalar_lea.vmem %s326_s3, %s259_s18 }
   0xe   : > { %v171_v4 = vld [vmem:[%s165_s21] sm:$0xff]  ;;  %v172_v5 = vld [vmem:[%s165_s21 + $0x8] sm:$0xff] }
  0x15   : > { %184 = vperm.xlu0 %270, %v181_v2  }
  0x7f   : > { %v177_v3 = vpop.permute.xlu0 %176 }
  0x80   : > { %v179_v6 = vmul.f32 %v177_v3, %v171_v4  ;;  %v180_v7 = vmul.f32 %v177_v3, %v172_v5 }
  0x87   : > { %v185_v8 = vpop.permute.xlu0 %184 }
  0x88   : > { %v187_v9 = vadd.f32 %v185_v8, %v179_v6  ;;  %v188_v10 = vadd.f32 %v185_v8, %v180_v7 }
  0x8a   : > { %v189_v11 = vmax.f32 %v187_v9, 0.0  ;;  %v190_v12 = vmax.f32 %v188_v10, 0.0 }
  0x8c   : > { %191 = vst [vmem:[%s170_s24] sm:$0xff] %v189_v11 }
  0x8d   : > { %192 = vst [vmem:[%s170_s24 + $0x8] sm:$0xff] %v190_v12 }
  0x8e PF: > { %s13_s12 = sadd.s32 1, %s277_s12  }
  0x8f   : > { %p10_p4 = scmp.ge.s32.totalorder %s13_s12, 4  }
  0x91   :  { %12 = sbr.rel (!%p10_p4) target bundleno = 1 (0x1), region = 62 }

// kernel: conv_block.2
= control target key start
LH: loop header
LB: loop body
LE: loop exit
PB: predicated region body
PF: predicated region fallthrough
CT: control target
= control target key end

     0   :  { %s1890_s12 = smov 0   ;;  %s2980_s0 = inlined_call_operand.vmem [shape: bf16[2,18,18,4], index: 0, kind: input, shape index: {}]   ;;  %s2981_s1 = inlined_call_operand.vmem [shape: bf16[8,36], index: 1, kind: input, shape index: {}]   ;;  %s2982_s2 = inlined_call_operand.vmem [shape: f32[2,8,256], index: 2, kind: output, shape index: {0}]   ;;  %s2983_s3 = inlined_call_operand.vmem [shape: f32[2,8,2], index: 3, kind: output, shape index: {1}]  }
   0x1 LB: > { %s1715_s13 = sadd.s32 4294967295, %s1860_s12   ;;  %p1719_p0 = scmp.ge.s32.totalorder %s1860_s12, 1  ;;  %s1860_s12 = sphi %s1890_s12, %s14_s12  }
   0x2   : > { %p140_p1 = scmp.lt.s32.totalorder %s1860_s12, 3 }
   0x4   : > { %p141_p2 = pnand %p1719_p0, %p140_p1 }
   0x6   : > { %144 = sbr.rel (%p141_p2) target bundleno = 775 (0x307), region = 28 }
   0xb   : > { %p168_p3 = scmp.lt.s32.totalorder %s1715_s13, 1  ;;  %vm236_vm0 = vsmask.f32 3328  ;;  %vm237_vm1 = vsmask.f32 7440  ;;  %s1862_s18 = smov 4  }
   0xc   : > { %vm1942_vm2 = vmor %vm236_vm0, %vm237_vm1  ;;  %vm671_vm3 = vcmask 1042432   ;;  %vm672_vm4 = vcmask 1046532   ;;  %s1863_s19 = smov 8   ;;  %s1864_s20 = smov 12   ;;  %vm1272_vm6 = vcmask 31744   ;;  %vm1321_vm7 = vcmask 64512  }
   0xd   : > { %s3044_s13 = smov (!%p168_p3, %s1715_s13), 1  ;;  %vm2229_vm5 = vmor %vm671_vm3, %vm672_vm4  ;;  %s1865_s21 = smov 20   ;;  %vm1354_vm8 = vcmask 97280   ;;  %vm1387_vm9 = vcmask 130048   ;;  %vm1420_vm10 = vcmask 162816   ;;  %vm1453_vm11 = vcmask 195584  }
   0xe   : > { %s1837_s14 = smul.u32 216, %s3044_s13  ;;  %s1866_s22 = smov 16   ;;  %vm1486_vm12 = vcmask 228352   ;;  %vm1519_vm13 = vcmask 261120   ;;  %vm1553_vm14 = vcmask 293888   ;;  %vm1623_vm15 = vcmask 7168  }
   0xf   : > { %s1867_s23 = smov 24   ;;  %s1868_s24 = smov 32   ;;  %vm1625_vm0 = vcmask 15360  }
  0x10   : > { %s1904_s17 = scalar_lea.vmem %s2980_s0, %s1837_s14  ;;  %s1869_s25 = smov 28  }
  0x11   : > { %v1907_v0 = vld [vmem:[%s1904_s17 + $0x30] sm:$0xf]  ;;  %v1910_v1 = vld [vmem:[%s1904_s17 + $0x34] sm:$0xf]  ;;  %v1913_v2 = vld [vmem:[%s1904_s17 + $0x38] sm:$0x1] }
  0x12   : > { %v336_v3 = vshrl.u32 %v1907_v0, 16  ;;  %v339_v4 = vshll.u32 %v1907_v0, 16  ;;  %v345_v5 = vshll.u32 %v1910_v1, 16  ;;  %v349_v6 = vshrl.u32 %v1910_v1, 16  ;;  %v1920_v7 = vld [vmem:[%s1904_s17 + $0x18] sm:$0xf] }
  0x13   : > { %v355_v8 = vshll.u32 %v1913_v2, 16  ;;  %v1924_v9 = vld [vmem:[%s1904_s17 + $0x1c] sm:$0xf]  ;;  %v1927_v10 = vld [vmem:[%s1904_s17 + $0x20] sm:$0x1]  ;;  %v288_v11 = vshrl.u32 %v1920_v7, 16 }
  0x14   : > { %v338_v12 = vrot.slane %v336_v3, 4  ;;  %v341_v13 = vrot.slane %v339_v4, 5  ;;  %v347_v14 = vrot.slane %v345_v5, 5  ;;  %v351_v15 = vrot.slane %v349_v6, 4  ;;  %v1931_v16 = vld [vmem:[%s1904_s17] sm:$0xf] }
  0x15   : > { %v357_v17 = vrot.slane %v355_v8, 5  ;;  %v290_v18 = vrot.slane %v288_v11, 4  ;;  %v291_v19 = vshll.u32 %v1920_v7, 16  ;;  %v297_v20 = vshll.u32 %v1924_v9, 16  ;;  %v1938_v25 = vld [vmem:[%s1904_s17 + $0x4] sm:$0xf] }
  0x16   : > { %v342_v21 = vor.u32 %v341_v13, %v338_v12  ;;  %v352_v22 = vor.u32 %v351_v15, %v347_v14  ;;  %v301_v23 = vshrl.u32 %v1924_v9, 16  ;;  %v307_v24 = vshll.u32 %v1927_v10, 16  ;;  %v1949_v36 = vld [vmem:[%s1904_s17 + $0x8] sm:$0x1]  ;;  %v1958_v44 = vld [vmem:[%s1904_s17 + $0x3c] sm:$0xf] }
  0x17   : > { %v293_v27 = vrot.slane %v291_v19, 5  ;;  %v299_v28 = vrot.slane %v297_v20, 5  ;;  %v240_v29 = vshrl.u32 %v1931_v16, 16  ;;  %v243_v30 = vshll.u32 %v1931_v16, 16  ;;  %v1966_v56 = vld [vmem:[%s1904_s17 + $0x40] sm:$0xf] }
  0x18   : > { %v343_v31 = vrot.slane %v342_v21, 4  ;;  %v353_v32 = vrot.slane %v352_v22, 4  ;;  %v303_v33 = vrot.slane %v301_v23, 4  ;;  %v309_v34 = vrot.slane %v307_v24, 5  ;;  %v1972_v62 = vld [vmem:[%s1904_s17 + $0x44] sm:$0x1] }
  0x19   : > { %v294_v35 = vor.u32 %v293_v27, %v290_v18  ;;  %v242_v37 = vrot.slane %v240_v29, 4  ;;  %v245_v38 = vrot.slane %v243_v30, 5  ;;  %v249_v39 = vshll.u32 %v1938_v25, 16  ;;  %v1975_v63 = vld [vmem:[%s1904_s17 + $0x24] sm:$0xf]  ;;  %s1818_s28 = sshll.u32 %s3044_s13, 4 }
  0x1a   : > { %v348_v40 = vsel %vm1942_vm2, %v343_v31, %v347_v14  ;;  %v358_v41 = vsel %vm1942_vm2, %v353_v32, %v357_v17  ;;  %v304_v42 = vor.u32 %v303_v33, %v299_v28  ;;  %v253_v43 = vshrl.u32 %v1938_v25, 16  ;;  %v1985_v14 = vld [vmem:[%s1904_s17 + $0x28] sm:$0xf]  ;;  %v1991_v19 = vld [vmem:[%s1904_s17 + $0x2c] sm:$0x1]  ;;  %s177_s4 = scalar_lea.vmem %s2982_s2, %s1818_s28  ;;  %s1723_s5 = sshll.u32 %s3044_s13, 3 }
  0x1b   : > { %v910_v45 = vunpack.c.l.b16 %v348_v40  ;;  %v911_v46 = vunpack.c.l.b16 %v358_v41  ;;  %v295_v47 = vrot.slane %v294_v35, 4  ;;  %v246_v48 = vor.u32 %v245_v38, %v242_v37  ;;  %v1998_v27 = vld [vmem:[%s1904_s17 + $0xc] sm:$0xf]  ;;  %v2006_v40 = vld [vmem:[%s1904_s17 + $0x10] sm:$0xf]  ;;  %s181_s8 = scalar_lea.vmem %s2983_s3, %s1723_s5 }
  0x1c   : > { %v305_v49 = vrot.slane %v304_v42, 4  ;;  %v251_v50 = vrot.slane %v249_v39, 5  ;;  %v255_v51 = vrot.slane %v253_v43, 4  ;;  %v259_v52 = vshll.u32 %v1949_v36, 16 }
  0x1d   : > { %v1961_v53 = vpack.c.b16 %v911_v46, %v910_v45  ;;  %v300_v54 = vsel %vm1942_vm2, %v295_v47, %v299_v28  ;;  %v247_v55 = vrot.slane %v246_v48, 4  ;;  %v360_v57 = vshrl.u32 %v1958_v44, 16  ;;  %v2010_v47 = vld [vmem:[%s1904_s17 + $0x14] sm:$0x1] }
  0x1e   : > { %v310_v58 = vsel %vm1942_vm2, %v305_v49, %v309_v34  ;;  %v906_v59 = vunpack.c.l.b16 %v300_v54  ;;  %v256_v60 = vor.u32 %v255_v51, %v251_v50  ;;  %v261_v61 = vrot.slane %v259_v52, 5  ;;  %v2017_v52 = vld [vmem:[%s1904_s17 + $0x60] sm:$0xf] }
  0x1f   : > { %3011 = vst [vmem:[#allocation2_spill] sm:$0xff] %v1961_v53  ;;  %958 = vrot.lane.b32.xlu2 %v1961_v53, %s1862_s18  ;;  %v907_v3 = vunpack.c.l.b16 %v310_v58  ;;  %v252_v4 = vsel %vm1942_vm2, %v247_v55, %v251_v50  ;;  %v362_v5 = vrot.slane %v360_v57, 4  ;;  %v363_v6 = vshll.u32 %v1958_v44, 16 }
  0x20   : > { %v257_v8 = vrot.slane %v256_v60, 4  ;;  %v902_v11 = vunpack.c.l.b16 %v252_v4  ;;  %v369_v12 = vshll.u32 %v1966_v56, 16  ;;  %v373_v13 = vshrl.u32 %v1966_v56, 16 }
  0x21   : > { %v1987_v15 = vpack.c.b16 %v907_v3, %v906_v59  ;;  %v365_v17 = vrot.slane %v363_v6, 5  ;;  %v379_v18 = vshll.u32 %v1972_v62, 16  ;;  %v312_v20 = vshrl.u32 %v1975_v63, 16 }
  0x22   : > { %v262_v21 = vsel %vm1942_vm2, %v257_v8, %v261_v61  ;;  %v371_v22 = vrot.slane %v369_v12, 5  ;;  %v375_v23 = vrot.slane %v373_v13, 4  ;;  %v315_v24 = vshll.u32 %v1975_v63, 16  ;;  %v2027_v8 = vld [vmem:[%s1904_s17 + $0x64] sm:$0xf] }
  0x23   : > { %3012 = vst [vmem:[#allocation3_spill] sm:$0xff] %v1987_v15  ;;  %954 = vrot.lane.b32.xlu1 %v1987_v15, %s1862_s18  ;;  %v903_v28 = vunpack.c.l.b16 %v262_v21  ;;  %v366_v29 = vor.u32 %v365_v17, %v362_v5  ;;  %v381_v30 = vrot.slane %v379_v18, 5  ;;  %v314_v31 = vrot.slane %v312_v20, 4  ;;  %v2033_v20 = vld [vmem:[%s1904_s17 + $0x68] sm:$0x1] }
  0x24   : > { %v376_v32 = vor.u32 %v375_v23, %v371_v22  ;;  %v317_v33 = vrot.slane %v315_v24, 5  ;;  %v321_v34 = vshll.u32 %v1985_v14, 16  ;;  %v325_v35 = vshrl.u32 %v1985_v14, 16  ;;  %v2036_v21 = vld [vmem:[%s1904_s17 + $0x54] sm:$0xf] }
  0x25   : > { %v934_v37 = vpack.c.b16 %v903_v28, %v902_v11  ;;  %v367_v38 = vrot.slane %v366_v29, 4  ;;  %v331_v39 = vshll.u32 %v1991_v19, 16  ;;  %v264_v41 = vshrl.u32 %v1998_v27, 16  ;;  %v2143_v15 = vld [vmem:[%s1904_s17 + $0x74] sm:$0x1] }
  0x26   : > { %v377_v42 = vrot.slane %v376_v32, 4  ;;  %v318_v43 = vor.u32 %v317_v33, %v314_v31  ;;  %v323_v45 = vrot.slane %v321_v34, 5  ;;  %v327_v46 = vrot.slane %v325_v35, 4 }
  0x27   : > { %950 = vrot.lane.b32.xlu0 %v934_v37, %s1862_s18  ;;  %v372_v48 = vsel %vm1942_vm2, %v367_v38, %v371_v22  ;;  %v333_v49 = vrot.slane %v331_v39, 5  ;;  %v266_v50 = vrot.slane %v264_v41, 4  ;;  %v267_v51 = vshll.u32 %v1998_v27, 16  ;;  %v2047_v37 = vld [vmem:[%s1904_s17 + $0x58] sm:$0xf] }
  0x28   : > { %v382_v54 = vsel %vm1942_vm2, %v377_v42, %v381_v30  ;;  %v912_v55 = vunpack.c.l.b16 %v372_v48  ;;  %v319_v57 = vrot.slane %v318_v43, 4  ;;  %v328_v58 = vor.u32 %v327_v46, %v323_v45 }
  0x29   : > { %v913_v59 = vunpack.c.l.b16 %v382_v54  ;;  %v269_v60 = vrot.slane %v267_v51, 5  ;;  %v273_v61 = vshll.u32 %v2006_v40, 16  ;;  %v277_v3 = vshrl.u32 %v2006_v40, 16 }
  0x2a   : > { %v324_v4 = vsel %vm1942_vm2, %v319_v57, %v323_v45  ;;  %v329_v5 = vrot.slane %v328_v58, 4  ;;  %v283_v6 = vshll.u32 %v2010_v47, 16  ;;  %v432_v11 = vshrl.u32 %v2017_v52, 16  ;;  %v2055_v45 = vld [vmem:[%s1904_s17 + $0x5c] sm:$0x1] }
  0x2b   : > { %v2030_v12 = vpack.c.b16 %v913_v59, %v912_v55  ;;  %v908_v13 = vunpack.c.l.b16 %v324_v4  ;;  %v270_v17 = vor.u32 %v269_v60, %v266_v50  ;;  %v275_v18 = vrot.slane %v273_v61, 5  ;;  %v2062_v58 = vld [vmem:[%s1904_s17 + $0x48] sm:$0xf] }
  0x2c   : > { %v334_v22 = vsel %vm1942_vm2, %v329_v5, %v333_v49  ;;  %v279_v23 = vrot.slane %v277_v3, 4  ;;  %v285_v24 = vrot.slane %v283_v6, 5  ;;  %v434_v28 = vrot.slane %v432_v11, 4 }
  0x2d   : > { %3013 = vst [vmem:[#allocation4_spill] sm:$0xff] %v2030_v12  ;;  %960 = vrot.lane.b32.xlu2 %v2030_v12, %s1862_s18  ;;  %v909_v29 = vunpack.c.l.b16 %v334_v22  ;;  %v271_v30 = vrot.slane %v270_v17, 4  ;;  %v435_v31 = vshll.u32 %v2017_v52, 16  ;;  %v441_v32 = vshll.u32 %v2027_v8, 16  ;;  %v2069_v22 = vld [vmem:[%s1904_s17 + $0x4c] sm:$0xf] }
  0x2e   : > { %v280_v33 = vor.u32 %v279_v23, %v275_v18  ;;  %v445_v34 = vshrl.u32 %v2027_v8, 16  ;;  %v451_v35 = vshll.u32 %v2033_v20, 16  ;;  %v408_v38 = vshrl.u32 %v2036_v21, 16  ;;  %v2170_v12 = vld [vmem:[%s1904_s17 + $0x9c] sm:$0xf] }
  0x2f   : > { %v2050_v39 = vpack.c.b16 %v909_v29, %v908_v13  ;;  %v276_v41 = vsel %vm1942_vm2, %v271_v30, %v275_v18  ;;  %v437_v42 = vrot.slane %v435_v31, 5  ;;  %v443_v43 = vrot.slane %v441_v32, 5  ;;  %v2077_v30 = vld [vmem:[%s1904_s17 + $0x50] sm:$0x1]  ;;  %v2081_v32 = vld [vmem:[%s1904_s17 + $0x84] sm:$0xf] }
  0x30   : > { %v281_v46 = vrot.slane %v280_v33, 4  ;;  %v904_v48 = vunpack.c.l.b16 %v276_v41  ;;  %v447_v49 = vrot.slane %v445_v34, 4  ;;  %v453_v50 = vrot.slane %v451_v35, 5 }
  0x31   : > { %3014 = vst [vmem:[#allocation5_spill] sm:$0xff] %v2050_v39  ;;  %956 = vrot.lane.b32.xlu1 %v2050_v39, %s1862_s18  ;;  %v438_v51 = vor.u32 %v437_v42, %v434_v28  ;;  %v410_v54 = vrot.slane %v408_v38, 4  ;;  %v411_v55 = vshll.u32 %v2036_v21, 16  ;;  %v417_v57 = vshll.u32 %v2047_v37, 16 }
  0x32   : > { %v286_v59 = vsel %vm1942_vm2, %v281_v46, %v285_v24  ;;  %v448_v60 = vor.u32 %v447_v49, %v443_v43  ;;  %v421_v61 = vshrl.u32 %v2047_v37, 16  ;;  %v427_v3 = vshll.u32 %v2055_v45, 16 }
  0x33   : > { %v905_v4 = vunpack.c.l.b16 %v286_v59  ;;  %v439_v5 = vrot.slane %v438_v51, 4  ;;  %v413_v6 = vrot.slane %v411_v55, 5  ;;  %v419_v11 = vrot.slane %v417_v57, 5 }
  0x34   : > { %v449_v13 = vrot.slane %v448_v60, 4  ;;  %v423_v17 = vrot.slane %v421_v61, 4  ;;  %v429_v18 = vrot.slane %v427_v3, 5  ;;  %v384_v23 = vshrl.u32 %v2062_v58, 16  ;;  %v2096_v60 = vld [vmem:[%s1904_s17 + $0x88] sm:$0xf] }
  0x35   : > { %v2072_v28 = vpack.c.b16 %v905_v4, %v904_v48  ;;  %v444_v24 = vsel %vm1942_vm2, %v439_v5, %v443_v43  ;;  %v414_v29 = vor.u32 %v413_v6, %v410_v54  ;;  %v387_v31 = vshll.u32 %v2062_v58, 16  ;;  %v2099_v61 = vld [vmem:[%s1904_s17 + $0x8c] sm:$0x1] }
  0x36   : > { %v454_v33 = vsel %vm1942_vm2, %v449_v13, %v453_v50  ;;  %v918_v34 = vunpack.c.l.b16 %v444_v24  ;;  %v424_v35 = vor.u32 %v423_v17, %v419_v11  ;;  %v386_v38 = vrot.slane %v384_v23, 4  ;;  %3017 = vst [vmem:[#allocation8_spill] sm:$0xff] %v2099_v61  ;;  %v2104_v13 = vld [vmem:[%s1904_s17 + $0x78] sm:$0xf] }
  0x37   : > { %3015 = vst [vmem:[#allocation6_spill] sm:$0xff] %v2072_v28  ;;  %952 = vrot.lane.b32.xlu0 %v2072_v28, %s1862_s18  ;;  %v919_v41 = vunpack.c.l.b16 %v454_v33  ;;  %v415_v42 = vrot.slane %v414_v29, 4  ;;  %v389_v43 = vrot.slane %v387_v31, 5  ;;  %v393_v46 = vshll.u32 %v2069_v22, 16 }
  0x38   : > { %v425_v48 = vrot.slane %v424_v35, 4  ;;  %v397_v49 = vshrl.u32 %v2069_v22, 16  ;;  %v403_v51 = vshll.u32 %v2077_v30, 16  ;;  %v504_v50 = vshrl.u32 %v2081_v32, 16 }
  0x39   : > { %v2091_v54 = vpack.c.b16 %v919_v41, %v918_v34  ;;  %v420_v55 = vsel %vm1942_vm2, %v415_v42, %v419_v11  ;;  %v390_v57 = vor.u32 %v389_v43, %v386_v38  ;;  %v395_v59 = vrot.slane %v393_v46, 5  ;;  %v2117_v41 = vld [vmem:[%s1904_s17 + $0x7c] sm:$0xf] }
  0x3a   : > { %v430_v3 = vsel %vm1942_vm2, %v425_v48, %v429_v18  ;;  %v916_v4 = vunpack.c.l.b16 %v420_v55  ;;  %v399_v5 = vrot.slane %v397_v49, 4  ;;  %v405_v6 = vrot.slane %v403_v51, 5  ;;  %v2121_v51 = vld [vmem:[%s1904_s17 + $0x80] sm:$0x1] }
  0x3b   : > { %3016 = vst [vmem:[#allocation7_spill] sm:$0xff] %v2091_v54  ;;  %966 = vrot.lane.b32.xlu2 %v2091_v54, %s1862_s18  ;;  %v917_v17 = vunpack.c.l.b16 %v430_v3  ;;  %v391_v11 = vrot.slane %v390_v57, 4  ;;  %v506_v23 = vrot.slane %v504_v50, 4  ;;  %v507_v24 = vshll.u32 %v2081_v32, 16  ;;  %v2127_v3 = vld [vmem:[%s1904_s17 + $0x6c] sm:$0xf] }
  0x3c   : > { %v400_v29 = vor.u32 %v399_v5, %v395_v59  ;;  %v513_v31 = vshll.u32 %v2096_v60, 16  ;;  %v517_v18 = vshrl.u32 %v2096_v60, 16  ;;  %v523_v33 = vshll.u32 %v2099_v61, 16  ;;  %v2189_v54 = vld [vmem:[%s1904_s17 + $0xa4] sm:$0x1] }
  0x3d   : > { %v2112_v34 = vpack.c.b16 %v917_v17, %v916_v4  ;;  %v396_v35 = vsel %vm1942_vm2, %v391_v11, %v395_v59  ;;  %v509_v38 = vrot.slane %v507_v24, 5  ;;  %v480_v42 = vshrl.u32 %v2104_v13, 16 }
  0x3e   : > { %v401_v43 = vrot.slane %v400_v29, 4  ;;  %v914_v46 = vunpack.c.l.b16 %v396_v35  ;;  %v515_v48 = vrot.slane %v513_v31, 5  ;;  %v519_v49 = vrot.slane %v517_v18, 4 }
  0x3f   : > { %3018 = vst [vmem:[#allocation9_spill] sm:$0xff] %v2112_v34  ;;  %964 = vrot.lane.b32.xlu1 %v2112_v34, %s1862_s18  ;;  %v510_v50 = vor.u32 %v509_v38, %v506_v23  ;;  %v525_v55 = vrot.slane %v523_v33, 5  ;;  %v482_v57 = vrot.slane %v480_v42, 4  ;;  %v483_v59 = vshll.u32 %v2104_v13, 16  ;;  %v2135_v38 = vld [vmem:[%s1904_s17 + $0x70] sm:$0xf] }
  0x40   : > { %v406_v4 = vsel %vm1942_vm2, %v401_v43, %v405_v6  ;;  %v520_v5 = vor.u32 %v519_v49, %v515_v48  ;;  %v489_v17 = vshll.u32 %v2117_v41, 16  ;;  %v493_v11 = vshrl.u32 %v2117_v41, 16 }
  0x41   : > { %v915_v24 = vunpack.c.l.b16 %v406_v4  ;;  %v511_v29 = vrot.slane %v510_v50, 4  ;;  %v485_v23 = vrot.slane %v483_v59, 5  ;;  %v499_v31 = vshll.u32 %v2121_v51, 16  ;;  %v2146_v50 = vld [vmem:[%s1904_s17 + $0xa8] sm:$0xf] }
  0x42   : > { %v521_v18 = vrot.slane %v520_v5, 4  ;;  %v491_v33 = vrot.slane %v489_v17, 5  ;;  %v495_v35 = vrot.slane %v493_v11, 4  ;;  %v456_v42 = vshrl.u32 %v2127_v3, 16  ;;  %3020 = vst [vmem:[#allocation11_spill] sm:$0xff] %v2146_v50 }
  0x43   : > { %v2138_v6 = vpack.c.b16 %v915_v24, %v914_v46  ;;  %v516_v43 = vsel %vm1942_vm2, %v511_v29, %v515_v48  ;;  %v486_v49 = vor.u32 %v485_v23, %v482_v57  ;;  %v501_v28 = vrot.slane %v499_v31, 5 }
  0x44   : > { %v526_v59 = vsel %vm1942_vm2, %v521_v18, %v525_v55  ;;  %v924_v4 = vunpack.c.l.b16 %v516_v43  ;;  %v496_v5 = vor.u32 %v495_v35, %v491_v33  ;;  %v458_v17 = vrot.slane %v456_v42, 4  ;;  %v2162_v43 = vld [vmem:[%s1904_s17 + $0xac] sm:$0xf] }
  0x45   : > { %3019 = vst [vmem:[#allocation10_spill] sm:$0xff] %v2138_v6  ;;  %962 = vrot.lane.b32.xlu0 %v2138_v6, %s1862_s18  ;;  %v925_v46 = vunpack.c.l.b16 %v526_v59  ;;  %v487_v11 = vrot.slane %v486_v49, 4  ;;  %v459_v48 = vshll.u32 %v2127_v3, 16  ;;  %v465_v57 = vshll.u32 %v2135_v38, 16  ;;  %v2165_v49 = vld [vmem:[%s1904_s17 + $0xb0] sm:$0x1] }
  0x46   : > { %v497_v24 = vrot.slane %v496_v5, 4  ;;  %v469_v29 = vshrl.u32 %v2135_v38, 16  ;;  %v475_v55 = vshll.u32 %v2143_v15, 16  ;;  %v576_v23 = vshrl.u32 %v2146_v50, 16  ;;  %3022 = vst [vmem:[#allocation13_spill] sm:$0xff] %v2162_v43 }
  0x47   : > { %v2157_v31 = vpack.c.b16 %v925_v46, %v924_v4  ;;  %v492_v18 = vsel %vm1942_vm2, %v487_v11, %v491_v33  ;;  %v461_v35 = vrot.slane %v459_v48, 5  ;;  %v467_v42 = vrot.slane %v465_v57, 5  ;;  %3023 = vst [vmem:[#allocation14_spill] sm:$0xff] %v2165_v49  ;;  %v2181_v6 = vld [vmem:[%s1904_s17 + $0xa0] sm:$0xf] }
  0x48   : > { %v502_v59 = vsel %vm1942_vm2, %v497_v24, %v501_v28  ;;  %v922_v5 = vunpack.c.l.b16 %v492_v18  ;;  %v471_v39 = vrot.slane %v469_v29, 4  ;;  %v477_v53 = vrot.slane %v475_v55, 5 }
  0x49   : > { %3021 = vst [vmem:[#allocation12_spill] sm:$0xff] %v2157_v31  ;;  %972 = vrot.lane.b32.xlu2 %v2157_v31, %s1862_s18  ;;  %v923_v4 = vunpack.c.l.b16 %v502_v59  ;;  %v462_v33 = vor.u32 %v461_v35, %v458_v17  ;;  %v578_v46 = vrot.slane %v576_v23, 4  ;;  %v579_v11 = vshll.u32 %v2146_v50, 16 }
  0x4a   : > { %v472_v48 = vor.u32 %v471_v39, %v467_v42  ;;  %v585_v57 = vshll.u32 %v2162_v43, 16  ;;  %v589_v28 = vshrl.u32 %v2162_v43, 16  ;;  %v595_v24 = vshll.u32 %v2165_v49, 16 }
  0x4b   : > { %v2178_v29 = vpack.c.b16 %v923_v4, %v922_v5  ;;  %v463_v55 = vrot.slane %v462_v33, 4  ;;  %v581_v18 = vrot.slane %v579_v11, 5  ;;  %v552_v17 = vshrl.u32 %v2170_v12, 16  ;;  %v2193_v33 = vld [vmem:[%s1904_s17 + $0x90] sm:$0xf] }
  0x4c   : > { %v473_v23 = vrot.slane %v472_v48, 4  ;;  %v587_v35 = vrot.slane %v585_v57, 5  ;;  %v591_v59 = vrot.slane %v589_v28, 4  ;;  %v597_v39 = vrot.slane %v595_v24, 5 }
  0x4d   : > { %3024 = vst [vmem:[#allocation15_spill] sm:$0xff] %v2178_v29  ;;  %970 = vrot.lane.b32.xlu1 %v2178_v29, %s1862_s18  ;;  %v468_v31 = vsel %vm1942_vm2, %v463_v55, %v467_v42  ;;  %v582_v34 = vor.u32 %v581_v18, %v578_v46  ;;  %v554_v5 = vrot.slane %v552_v17, 4  ;;  %v555_v4 = vshll.u32 %v2170_v12, 16 }
  0x4e   : > { %v478_v11 = vsel %vm1942_vm2, %v473_v23, %v477_v53  ;;  %v920_v48 = vunpack.c.l.b16 %v468_v31  ;;  %v592_v57 = vor.u32 %v591_v59, %v587_v35  ;;  %v561_v28 = vshll.u32 %v2181_v6, 16  ;;  %v2206_v59 = vld [vmem:[%s1904_s17 + $0x94] sm:$0xf] }
  0x4f   : > { %v921_v24 = vunpack.c.l.b16 %v478_v11  ;;  %v583_v29 = vrot.slane %v582_v34, 4  ;;  %v557_v42 = vrot.slane %v555_v4, 5  ;;  %v565_v46 = vshrl.u32 %v2181_v6, 16  ;;  %v2209_v11 = vld [vmem:[%s1904_s17 + $0x98] sm:$0x1] }
  0x50   : > { %v593_v55 = vrot.slane %v592_v57, 4  ;;  %v563_v18 = vrot.slane %v561_v28, 5  ;;  %v571_v17 = vshll.u32 %v2189_v54, 16  ;;  %v528_v49 = vshrl.u32 %v2193_v33, 16 }
  0x51   : > { %v2201_v43 = vpack.c.b16 %v921_v24, %v920_v48  ;;  %v588_v53 = vsel %vm1942_vm2, %v583_v29, %v587_v35  ;;  %v558_v31 = vor.u32 %v557_v42, %v554_v5  ;;  %v567_v23 = vrot.slane %v565_v46, 4 }
  0x52   : > { %v598_v34 = vsel %vm1942_vm2, %v593_v55, %v597_v39  ;;  %v930_v4 = vunpack.c.l.b16 %v588_v53  ;;  %v573_v57 = vrot.slane %v571_v17, 5  ;;  %v530_v28 = vrot.slane %v528_v49, 4 }
  0x53   : > { %3025 = vst [vmem:[#allocation16_spill] sm:$0xff] %v2201_v43  ;;  %968 = vrot.lane.b32.xlu0 %v2201_v43, %s1862_s18  ;;  %v931_v48 = vunpack.c.l.b16 %v598_v34  ;;  %v559_v24 = vrot.slane %v558_v31, 4  ;;  %v568_v50 = vor.u32 %v567_v23, %v563_v18  ;;  %v531_v29 = vshll.u32 %v2193_v33, 16 }
  0x54   : > { %v537_v35 = vshll.u32 %v2206_v59, 16  ;;  %v541_v5 = vshrl.u32 %v2206_v59, 16  ;;  %v547_v42 = vshll.u32 %v2209_v11, 16 }
  0x55   : > { %v2219_v46 = vpack.c.b16 %v931_v48, %v930_v4  ;;  %v564_v49 = vsel %vm1942_vm2, %v559_v24, %v563_v18  ;;  %v569_v39 = vrot.slane %v568_v50, 4  ;;  %v533_v55 = vrot.slane %v531_v29, 5 }
  0x56   : > { %v928_v17 = vunpack.c.l.b16 %v564_v49  ;;  %v539_v53 = vrot.slane %v537_v35, 5  ;;  %v543_v31 = vrot.slane %v541_v5, 4  ;;  %v549_v23 = vrot.slane %v547_v42, 5 }
  0x57   : > { %978 = vrot.lane.b32.xlu2 %v2219_v46, %s1862_s18  ;;  %v574_v34 = vsel %vm1942_vm2, %v569_v39, %v573_v57  ;;  %v534_v43 = vor.u32 %v533_v55, %v530_v28  ;;  %v1725_v4 = vrot.slane %v1998_v27, 9  ;;  %v683_v18 = vrot.slane %v2006_v40, 5  ;;  %v2243_v39 = vld [vmem:[%s1904_s17 + $0xb4] sm:$0xf] }
  0x58   : > { %v929_v48 = vunpack.c.l.b16 %v574_v34  ;;  %v544_v61 = vor.u32 %v543_v31, %v539_v53  ;;  %v686_v24 = vrot.slane %v2010_v47, 5  ;;  %v1724_v57 = vrot.slane %v1931_v16, 9  ;;  %v2259_v31 = vld [vmem:[%s1904_s17 + $0xbc] sm:$0x1] }
  0x59   : > { %v535_v29 = vrot.slane %v534_v43, 4  ;;  %v676_v28 = vrot.slane %v1938_v25, 5  ;;  %v679_v35 = vrot.slane %v1949_v36, 5  ;;  %v684_v42 = vsel %vm2229_vm5, %v1725_v4, %v683_v18  ;;  %v2250_v43 = vld [vmem:[%s1904_s17 + $0xb8] sm:$0xf] }
  0x5a   : > { %v2238_v27 = vpack.c.b16 %v929_v48, %v928_v17  ;;  %v545_v5 = vrot.slane %v544_v61, 4  ;;  %v685_v49 = vrot.slane %v683_v18, 4  ;;  %v984_v47 = vunpack.c.l.b16 %v684_v42 }
  0x5b   : > { %v540_v40 = vsel %vm1942_vm2, %v535_v29, %v539_v53  ;;  %v677_v16 = vsel %vm2229_vm5, %v1724_v57, %v676_v28  ;;  %v678_v25 = vrot.slane %v676_v28, 4  ;;  %v600_v48 = vshrl.u32 %v2243_v39, 16 }
  0x5c   : > { %976 = vrot.lane.b32.xlu1 %v2238_v27, %s1862_s18  ;;  %v550_v36 = vsel %vm1942_vm2, %v545_v5, %v549_v23  ;;  %v926_v61 = vunpack.c.l.b16 %v540_v40  ;;  %v687_v55 = vsel %vm2229_vm5, %v685_v49, %v686_v24  ;;  %v982_v17 = vunpack.c.l.b16 %v677_v16 }
  0x5d   : > { %v927_v53 = vunpack.c.l.b16 %v550_v36  ;;  %v985_v34 = vunpack.c.l.b16 %v687_v55  ;;  %v680_v4 = vsel %vm2229_vm5, %v678_v25, %v679_v35  ;;  %v603_v29 = vshll.u32 %v2243_v39, 16 }
  0x5e   : > { %v983_v18 = vunpack.c.l.b16 %v680_v4  ;;  %v609_v57 = vshll.u32 %v2250_v43, 16  ;;  %v613_v23 = vshrl.u32 %v2250_v43, 16  ;;  %v602_v5 = vrot.slane %v600_v48, 4 }
  0x5f   : > { %v2267_v28 = vpack.c.b16 %v927_v53, %v926_v61  ;;  %v2269_v24 = vpack.c.b16 %v985_v34, %v984_v47  ;;  %v619_v42 = vshll.u32 %v2259_v31, 16  ;;  %v605_v40 = vrot.slane %v603_v29, 5 }
  0x60   : > { %v1014_v49 = vpack.c.b16 %v983_v18, %v982_v17  ;;  %v611_v16 = vrot.slane %v609_v57, 5  ;;  %v615_v35 = vrot.slane %v613_v23, 4  ;;  %v1728_v36 = vrot.slane %v1907_v0, 9 }
  0x61   : > { %974 = vrot.lane.b32.xlu0 %v2267_v28, %s1862_s18  ;;  %1032 = vrot.lane.b32.xlu2 %v2269_v24, %s1863_s19  ;;  %v621_v25 = vrot.slane %v619_v42, 5  ;;  %v704_v47 = vrot.slane %v1910_v1, 5  ;;  %v707_v61 = vrot.slane %v1913_v2, 5  ;;  %v606_v55 = vor.u32 %v605_v40, %v602_v5 }
  0x62   : > { %v616_v53 = vor.u32 %v615_v35, %v611_v16  ;;  %v1727_v17 = vrot.slane %v1975_v63, 9  ;;  %v697_v34 = vrot.slane %v1985_v14, 5  ;;  %v700_v18 = vrot.slane %v1991_v19, 5 }
  0x63   : > { %v705_v4 = vsel %vm2229_vm5, %v1728_v36, %v704_v47  ;;  %v706_v48 = vrot.slane %v704_v47, 4  ;;  %v1726_v29 = vrot.slane %v1920_v7, 9  ;;  %v607_v0 = vrot.slane %v606_v55, 4 }
  0x64   : > { %1030 = vrot.lane.b32.xlu1 %v1014_v49, %s1863_s19  ;;  %v617_v1 = vrot.slane %v616_v53, 4  ;;  %v990_v57 = vunpack.c.l.b16 %v705_v4  ;;  %v698_v2 = vsel %vm2229_vm5, %v1727_v17, %v697_v34  ;;  %v699_v14 = vrot.slane %v697_v34, 4 }
  0x65   : > { %v708_v63 = vsel %vm2229_vm5, %v706_v48, %v707_v61  ;;  %v988_v23 = vunpack.c.l.b16 %v698_v2  ;;  %v690_v5 = vrot.slane %v1924_v9, 5  ;;  %v612_v19 = vsel %vm1942_vm2, %v607_v0, %v611_v16 }
  0x66   : > { %v622_v7 = vsel %vm1942_vm2, %v617_v1, %v621_v25  ;;  %v991_v42 = vunpack.c.l.b16 %v708_v63  ;;  %v693_v49 = vrot.slane %v1927_v10, 5  ;;  %v932_v40 = vunpack.c.l.b16 %v612_v19 }
  0x67   : > { %v933_v35 = vunpack.c.l.b16 %v622_v7  ;;  %v701_v36 = vsel %vm2229_vm5, %v699_v14, %v700_v18  ;;  %v691_v47 = vsel %vm2229_vm5, %v1726_v29, %v690_v5  ;;  %v692_v55 = vrot.slane %v690_v5, 4 }
  0x68   : > { %v2300_v61 = vpack.c.b16 %v991_v42, %v990_v57  ;;  %v989_v9 = vunpack.c.l.b16 %v701_v36  ;;  %v986_v53 = vunpack.c.l.b16 %v691_v47  ;;  %v1731_v25 = vrot.slane %v2036_v21, 9 }
  0x69   : > { %v2302_v16 = vpack.c.b16 %v933_v35, %v932_v40  ;;  %v725_v17 = vrot.slane %v2047_v37, 5  ;;  %v728_v10 = vrot.slane %v2055_v45, 5  ;;  %v694_v4 = vsel %vm2229_vm5, %v692_v55, %v693_v49 }
  0x6a   : > { %1038 = vrot.lane.b32.xlu2 %v2300_v61, %s1863_s19  ;;  %v2309_v34 = vpack.c.b16 %v989_v9, %v988_v23  ;;  %v1730_v48 = vrot.slane %v2062_v58, 9  ;;  %v718_v18 = vrot.slane %v2069_v22, 5  ;;  %v987_v21 = vunpack.c.l.b16 %v694_v4 }
  0x6b   : > { %980 = vrot.lane.b32.xlu0 %v2302_v16, %s1862_s18  ;;  %v726_v37 = vsel %vm2229_vm5, %v1731_v25, %v725_v17  ;;  %v727_v45 = vrot.slane %v725_v17, 4  ;;  %v721_v29 = vrot.slane %v2077_v30, 5  ;;  %v1729_v22 = vrot.slane %v1958_v44, 9 }
  0x6c   : > { %1036 = vrot.lane.b32.xlu1 %v2309_v34, %s1863_s19  ;;  %v996_v0 = vunpack.c.l.b16 %v726_v37  ;;  %v719_v1 = vsel %vm2229_vm5, %v1730_v48, %v718_v18  ;;  %v720_v58 = vrot.slane %v718_v18, 4  ;;  %v2325_v57 = vpack.c.b16 %v987_v21, %v986_v53 }
  0x6d   : > { %v729_v2 = vsel %vm2229_vm5, %v727_v45, %v728_v10  ;;  %v994_v63 = vunpack.c.l.b16 %v719_v1  ;;  %v711_v14 = vrot.slane %v1966_v56, 5  ;;  %v714_v5 = vrot.slane %v1972_v62, 5 }
  0x6e   : > { %v997_v23 = vunpack.c.l.b16 %v729_v2  ;;  %v722_v30 = vsel %vm2229_vm5, %v720_v58, %v721_v29  ;;  %v1734_v19 = vrot.slane %v2104_v13, 9  ;;  %v746_v49 = vrot.slane %v2117_v41, 5 }
  0x6f   : > { %v995_v7 = vunpack.c.l.b16 %v722_v30  ;;  %v712_v44 = vsel %vm2229_vm5, %v1729_v22, %v711_v14  ;;  %v713_v42 = vrot.slane %v711_v14, 4  ;;  %v749_v35 = vrot.slane %v2121_v51, 5 }
  0x70   : > { %v2337_v40 = vpack.c.b16 %v997_v23, %v996_v0  ;;  %v1733_v56 = vrot.slane %v2127_v3, 9  ;;  %v747_v13 = vsel %vm2229_vm5, %v1734_v19, %v746_v49  ;;  %v748_v47 = vrot.slane %v746_v49, 4 }
  0x71   : > { %v2341_v36 = vpack.c.b16 %v995_v7, %v994_v63  ;;  %v715_v62 = vsel %vm2229_vm5, %v713_v42, %v714_v5  ;;  %v992_v9 = vunpack.c.l.b16 %v712_v44  ;;  %v1002_v41 = vunpack.c.l.b16 %v747_v13  ;;  %v3028_v7 = vld [vmem:[#allocation8_spill] sm:$0xff] }
  0x72   : > { %1044 = vrot.lane.b32.xlu2 %v2337_v40, %s1863_s19  ;;  %v739_v55 = vrot.slane %v2135_v38, 5  ;;  %v742_v51 = vrot.slane %v2143_v15, 5  ;;  %v993_v3 = vunpack.c.l.b16 %v715_v62  ;;  %v750_v53 = vsel %vm2229_vm5, %v748_v47, %v749_v35 }
  0x73   : > { %1034 = vrot.lane.b32.xlu0 %v2325_v57, %s1863_s19  ;;  %v1732_v25 = vrot.slane %v2017_v52, 9  ;;  %v732_v17 = vrot.slane %v2027_v8, 5  ;;  %v1003_v10 = vunpack.c.l.b16 %v750_v53  ;;  %v735_v15 = vrot.slane %v2033_v20, 5  ;;  %v3030_v53 = vld [vmem:[#allocation13_spill] sm:$0xff] }
  0x74   : > { %1042 = vrot.lane.b32.xlu1 %v2341_v36, %s1863_s19  ;;  %v740_v38 = vsel %vm2229_vm5, %v1733_v56, %v739_v55  ;;  %v741_v4 = vrot.slane %v739_v55, 4  ;;  %v1737_v21 = vrot.slane %v2170_v12, 9  ;;  %v767_v45 = vrot.slane %v2181_v6, 5  ;;  %v3029_v55 = vld [vmem:[#allocation11_spill] sm:$0xff] }
  0x75   : > { %v1000_v48 = vunpack.c.l.b16 %v740_v38  ;;  %v734_v18 = vrot.slane %v732_v17, 4  ;;  %v2363_v37 = vpack.c.b16 %v1003_v10, %v1002_v41  ;;  %v733_v8 = vsel %vm2229_vm5, %v1732_v25, %v732_v17  ;;  %v3031_v10 = vld [vmem:[#allocation14_spill] sm:$0xff] }
  0x76   : > { %v743_v52 = vsel %vm2229_vm5, %v741_v4, %v742_v51  ;;  %v2370_v29 = vpack.c.b16 %v993_v3, %v992_v9  ;;  %v770_v1 = vrot.slane %v2189_v54, 5  ;;  %v1736_v20 = vrot.slane %v2193_v33, 9 }
  0x77   : > { %v1001_v0 = vunpack.c.l.b16 %v743_v52  ;;  %v736_v12 = vsel %vm2229_vm5, %v734_v18, %v735_v15  ;;  %v768_v58 = vsel %vm2229_vm5, %v1737_v21, %v767_v45  ;;  %v769_v22 = vrot.slane %v767_v45, 4 }
  0x78   : > { %v760_v2 = vrot.slane %v2206_v59, 5  ;;  %v998_v14 = vunpack.c.l.b16 %v733_v8  ;;  %v763_v6 = vrot.slane %v2209_v11, 5  ;;  %v1735_v23 = vrot.slane %v2081_v32, 9 }
  0x79   : > { %v2379_v63 = vpack.c.b16 %v1001_v0, %v1000_v48  ;;  %v771_v54 = vsel %vm2229_vm5, %v769_v22, %v770_v1  ;;  %v1008_v33 = vunpack.c.l.b16 %v768_v58  ;;  %v999_v59 = vunpack.c.l.b16 %v736_v12  ;;  %v2430_v1 = vld [vmem:[%s1904_s17 + $0xc] sm:$0xff]  ;;  %v2436_v58 = vpop.permute.xlu2 %958  ;;  %v2445_v22 = vld [vmem:[%s1904_s17 + $0xc0] sm:$0xf] }
  0x7a   : > { %1050 = vrot.lane.b32.xlu2 %v2363_v37, %s1863_s19  ;;  %v761_v30 = vsel %vm2229_vm5, %v1736_v20, %v760_v2  ;;  %v762_v5 = vrot.slane %v760_v2, 4  ;;  %v1009_v19 = vunpack.c.l.b16 %v771_v54  ;;  %v753_v11 = vrot.slane %v2096_v60, 5  ;;  %v2448_v2 = vld [vmem:[%s1904_s17 + $0xc4] sm:$0xf] }
  0x7b   : > { %1040 = vrot.lane.b32.xlu0 %v2370_v29, %s1863_s19  ;;  %v756_v32 = vrot.slane %v3028_v7, 5  ;;  %v1006_v42 = vunpack.c.l.b16 %v761_v30  ;;  %v1739_v49 = vrot.slane %v2243_v39, 9  ;;  %v781_v35 = vrot.slane %v2250_v43, 5 }
  0x7c   : > { %1048 = vrot.lane.b32.xlu1 %v2379_v63, %s1863_s19  ;;  %v764_v44 = vsel %vm2229_vm5, %v762_v5, %v763_v6  ;;  %v754_v62 = vsel %vm2229_vm5, %v1735_v23, %v753_v11  ;;  %v755_v13 = vrot.slane %v753_v11, 4  ;;  %v784_v60 = vrot.slane %v2259_v31, 5  ;;  %v2454_v6 = vld [vmem:[%s1904_s17 + $0x24] sm:$0xff] }
  0x7d   : > { %v1007_v56 = vunpack.c.l.b16 %v764_v44  ;;  %v2402_v47 = vpack.c.b16 %v1009_v19, %v1008_v33  ;;  %v1004_v9 = vunpack.c.l.b16 %v754_v62  ;;  %v783_v41 = vrot.slane %v781_v35, 4  ;;  %v2470_v44 = vld [vmem:[%s1904_s17 + $0x54] sm:$0xff] }
  0x7e   : > { %v1738_v51 = vrot.slane %v3029_v55, 9  ;;  %v2405_v3 = vpack.c.b16 %v999_v59, %v998_v14  ;;  %v757_v39 = vsel %vm2229_vm5, %v755_v13, %v756_v32  ;;  %v774_v43 = vrot.slane %v3030_v53, 5  ;;  %v2451_v14 = vld [vmem:[%s1904_s17 + $0x30] sm:$0xff]  ;;  %v232_v32 = vld [vmem:[%s1904_s17 + $0xc8] sm:$0x1]  ;;  %v2487_v55 = vld [vmem:[%s1904_s17 + $0xc0] sm:$0xff] }
  0x7f   : > { %v2410_v25 = vpack.c.b16 %v1007_v56, %v1006_v42  ;;  %v1005_v17 = vunpack.c.l.b16 %v757_v39  ;;  %v777_v38 = vrot.slane %v3031_v10, 5  ;;  %v782_v31 = vsel %vm2229_vm5, %v1739_v49, %v781_v35  ;;  %v2473_v42 = vld [vmem:[%s1904_s17 + $0x18] sm:$0xff]  ;;  %v2476_v49 = vld [vmem:[%s1904_s17 + $0x48] sm:$0xff]  ;;  %v2493_v39 = vld [vmem:[%s1904_s17 + $0xd0] sm:$0xf] }
  0x80   : > { %v785_v4 = vsel %vm2229_vm5, %v783_v41, %v784_v60  ;;  %v775_v15 = vsel %vm2229_vm5, %v1738_v51, %v774_v43  ;;  %v776_v48 = vrot.slane %v774_v43, 4  ;;  %v1012_v8 = vunpack.c.l.b16 %v782_v31  ;;  %v2490_v51 = vld [vmem:[%s1904_s17 + $0xcc] sm:$0xf]  ;;  %v2496_v53 = vld [vmem:[%s1904_s17 + $0x3c] sm:$0xff] }
  0x81   : > { %v2421_v18 = vpack.c.b16 %v1005_v17, %v1004_v9  ;;  %v1010_v21 = vunpack.c.l.b16 %v775_v15  ;;  %v1013_v45 = vunpack.c.l.b16 %v785_v4  ;;  %v787_v23 = vshrl.u32 %v2445_v22, 16  ;;  %v2501_v17 = vld [vmem:[%s1904_s17 + $0x6c] sm:$0xff] }
  0x82   : > { %1056 = vrot.lane.b32.xlu2 %v2402_v47, %s1863_s19  ;;  %v778_v52 = vsel %vm2229_vm5, %v776_v48, %v777_v38  ;;  %v790_v54 = vshll.u32 %v2445_v22, 16  ;;  %v796_v33 = vshll.u32 %v2448_v2, 16  ;;  %v800_v30 = vshrl.u32 %v2448_v2, 16 }
  0x83   : > { %1046 = vrot.lane.b32.xlu0 %v2405_v3, %s1863_s19  ;;  %v1011_v0 = vunpack.c.l.b16 %v778_v52  ;;  %v2434_v12 = vpack.c.b16 %v1013_v45, %v1012_v8  ;;  %v789_v59 = vrot.slane %v787_v23, 4  ;;  %v806_v62 = vshll.u32 %v232_v32, 16 }
  0x84   : > { %1054 = vrot.lane.b32.xlu1 %v2410_v25, %s1863_s19  ;;  %v792_v19 = vrot.slane %v790_v54, 5  ;;  %v798_v11 = vrot.slane %v796_v33, 5  ;;  %v802_v7 = vrot.slane %v800_v30, 4  ;;  %v821_v31 = vshrl.u32 %v2490_v51, 16  ;;  %v235_v33 = vld [vmem:[%s1904_s17 + $0xd4] sm:$0x1] }
  0x85   : > { %v2432_v20 = vpack.c.b16 %v1011_v0, %v1010_v21  ;;  %v808_v9 = vrot.slane %v806_v62, 5  ;;  %v824_v4 = vshll.u32 %v2490_v51, 16  ;;  %v830_v15 = vshll.u32 %v2493_v39, 16  ;;  %v2521_v30 = vld [vmem:[%s1904_s17 + $0x60] sm:$0xff] }
  0x86   : > { %v793_v35 = vor.u32 %v792_v19, %v789_v59  ;;  %v803_v56 = vor.u32 %v802_v7, %v798_v11  ;;  %v834_v48 = vshrl.u32 %v2493_v39, 16  ;;  %v823_v8 = vrot.slane %v821_v31, 4 }
  0x87   : > { %v2464_v5 = vpop.permute.xlu2 %960  ;;  %v826_v45 = vrot.slane %v824_v4, 5  ;;  %v832_v0 = vrot.slane %v830_v15, 5  ;;  %v840_v62 = vshll.u32 %v235_v33, 16  ;;  %v1836_v4 = vld [vmem:[%s1904_s17 + $0xcc] sm:$0xff] }
  0x88   : > { %v794_v13 = vrot.slane %v793_v35, 4  ;;  %v804_v60 = vrot.slane %v803_v56, 4  ;;  %v836_v23 = vrot.slane %v834_v48, 4 }
  0x89   : > { %v827_v35 = vor.u32 %v826_v45, %v823_v8  ;;  %v842_v31 = vrot.slane %v840_v62, 5 }
  0x8a   : > { %1065 = vrot.lane.b32.xlu2 %v2430_v1, %s1864_s20  ;;  %v799_v10 = vsel %vm1942_vm2, %v794_v13, %v798_v11  ;;  %v809_v38 = vsel %vm1942_vm2, %v804_v60, %v808_v9  ;;  %v815_v11 = vrot.slane %v2448_v2, 5  ;;  %v837_v56 = vor.u32 %v836_v23, %v832_v0 }
  0x8b   : > { %1052 = vrot.lane.b32.xlu0 %v2421_v18, %s1863_s19  ;;  %v1097_v21 = vunpack.c.l.b16 %v799_v10  ;;  %v1098_v52 = vunpack.c.l.b16 %v809_v38  ;;  %v1740_v2 = vrot.slane %v2445_v22, 9  ;;  %v818_v9 = vrot.slane %v232_v32, 5  ;;  %v3032_v32 = vld [vmem:[#allocation7_spill] sm:$0xff] }
  0x8c   : > { %1060 = vrot.lane.b32.xlu1 %v2434_v12, %s1863_s19  ;;  %v817_v60 = vrot.slane %v815_v11, 4  ;;  %v828_v10 = vrot.slane %v827_v35, 4  ;;  %v838_v38 = vrot.slane %v837_v56, 4 }
  0x8d   : > { %v2525_v19 = vpack.c.b16 %v1098_v52, %v1097_v21  ;;  %v816_v15 = vsel %vm2229_vm5, %v1740_v2, %v815_v11 }
  0x8e   : > { %v833_v52 = vsel %vm1942_vm2, %v828_v10, %v832_v0  ;;  %v843_v22 = vsel %vm1942_vm2, %v838_v38, %v842_v31  ;;  %v1132_v8 = vunpack.c.l.b16 %v816_v15  ;;  %v849_v0 = vrot.slane %v2493_v39, 5  ;;  %v2565_v10 = vld [vmem:[%s1904_s17 + $0xb4] sm:$0xff] }
  0x8f   : > { %v1202_v23 = vunpack.c.l.b16 %v833_v52  ;;  %v1203_v11 = vunpack.c.l.b16 %v843_v22  ;;  %v852_v39 = vrot.slane %v235_v33, 5  ;;  %v3034_v15 = vld [vmem:[#allocation16_spill] sm:$0xff] }
  0x91   : > { %v1204_v35 = vpack.c.b16 %v1203_v11, %v1202_v23 }
  0x92   : > { %1071 = vrot.lane.b32.xlu2 %v2451_v14, %s1864_s20 }
  0x93   : > { %1058 = vrot.lane.b32.xlu0 %v2432_v20, %s1863_s19 }
  0x94   : > { %1069 = vrot.lane.b32.xlu1 %v2454_v6, %s1864_s20 }
  0x95   : > { %v2484_v41 = vpop.permute.xlu2 %966  ;;  %v2517_v54 = vpop.permute.xlu1 %954 }
  0x99   : > { %v2498_v43 = vpop.permute.xlu0 %950 }
  0x9a   : > { %1077 = vrot.lane.b32.xlu2 %v2470_v44, %s1864_s20 }
  0x9b   : > { %1067 = vrot.lane.b32.xlu0 %v2473_v42, %s1864_s20 }
  0x9c   : > { %1075 = vrot.lane.b32.xlu1 %v2476_v49, %s1864_s20 }
  0xa2   : > { %1095 = vrot.lane.b32.xlu2 %v2487_v55, %s1864_s20 }
  0xa3   : > { %1073 = vrot.lane.b32.xlu0 %v2496_v53, %s1864_s20  ;;  %v2523_v59 = vpop.permute.xlu2 %972  ;;  %v2542_v48 = vpop.permute.xlu1 %956 }
  0xa4   : > { %1081 = vrot.lane.b32.xlu1 %v2501_v17, %s1864_s20 }
  0xa9   : > { %v953_v7 = vpop.permute.xlu0 %952 }
  0xaa   : > { %1149 = vrot.lane.b32.xlu2 %v2405_v3, %s1865_s21  ;;  %v1278_v13 = vsel %vm1272_vm6, %v2430_v1, %v953_v7  ;;  %v819_v1 = vsel %vm2229_vm5, %v817_v60, %v818_v9  ;;  %v1741_v60 = vrot.slane %v2490_v51, 9  ;;  %v851_v9 = vrot.slane %v849_v0, 4 }
  0xab   : > { %1079 = vrot.lane.b32.xlu0 %v2521_v30, %s1864_s20  ;;  %v1133_v45 = vunpack.c.l.b16 %v819_v1  ;;  %v1287_v51 = vsel %vm1272_vm6, %v2451_v14, %v2436_v58 }
  0xac   : > { %1130 = vrot.lane.b32.xlu1 %v2525_v19, %s1866_s22  ;;  %v850_v38 = vsel %vm2229_vm5, %v1741_v60, %v849_v0  ;;  %v853_v31 = vsel %vm2229_vm5, %v851_v9, %v852_v39  ;;  %v2596_v0 = vld [vmem:[%s1904_s17 + $0x78] sm:$0xff] }
  0xad   : > { %v1134_v7 = vpack.c.b16 %v1133_v45, %v1132_v8  ;;  %v1238_v1 = vunpack.c.l.b16 %v853_v31  ;;  %v2614_v31 = vld [vmem:[%s1904_s17 + $0x9c] sm:$0xff] }
  0xb1   : > { %v2544_v21 = vpop.permute.xlu2 %978  ;;  %v965_v26 = vpop.permute.xlu1 %964 }
  0xb2   : > { %1200 = vrot.lane.b32.xlu2 %v1836_v4, %s1867_s23  ;;  %v3033_v4 = vld [vmem:[#allocation9_spill] sm:$0xff]  ;;  %v1296_v58 = vsel %vm1272_vm6, %v2470_v44, %v965_v26 }
  0xb3   : > { %1114 = vrot.lane.b32.xlu0 %v3032_v32, %s1866_s22 }
  0xb4   : > { %1184 = vrot.lane.b32.xlu1 %v2501_v17, %s1867_s23 }
  0xb7   : > { %v963_v62 = vpop.permute.xlu0 %962 }
  0xba   : > { %1254 = vrot.lane.b32.xlu2 %v2379_v63, %s1868_s24 }
  0xbb   : > { %1165 = vrot.lane.b32.xlu0 %v1134_v7, %s1865_s21  ;;  %v1033_v56 = vpop.permute.xlu2 %1032 }
  0xbc   : > { %1235 = vrot.lane.b32.xlu1 %v1204_v35, %s1869_s25  ;;  %v2561_v2 = vsel %vm1321_vm7, %v1278_v13, %v1033_v56  ;;  %v1237_v13 = vunpack.c.l.b16 %v850_v38 }
  0xbe   : > { %v1239_v45 = vpack.c.b16 %v1238_v1, %v1237_v13 }
  0xbf   : > { %v971_v33 = vpop.permute.xlu1 %970 }
  0xc0   : > { %v1305_v26 = vsel %vm1272_vm6, %v2596_v0, %v971_v33 }
  0xc2   : > { %1112 = vrot.lane.b32.xlu2 %v3033_v4, %s1866_s22 }
  0xc3   : > { %1219 = vrot.lane.b32.xlu0 %v3034_v15, %s1869_s25 }
  0xc4   : > { %1093 = vrot.lane.b32.xlu1 %v2565_v10, %s1864_s20  ;;  %v1039_v50 = vpop.permute.xlu2 %1038 }
  0xc5   : > { %v2581_v52 = vsel %vm1321_vm7, %v1287_v51, %v1039_v50  ;;  %v969_v22 = vpop.permute.xlu0 %968  ;;  %v1284_v51 = vsel %vm1272_vm6, %v2454_v6, %v2542_v48  ;;  %v1281_v48 = vsel %vm1272_vm6, %v2473_v42, %v2517_v54 }
  0xc6   : > { %v1302_v8 = vsel %vm1272_vm6, %v2501_v17, %v969_v22  ;;  %v1819_v17 = vld [vmem:[%s1904_s17] sm:$0xff] }
  0xc7   : > { %v1275_v39 = vsel %vm1272_vm6, %v1819_v17, %v2498_v43 }
  0xca   : > { %1163 = vrot.lane.b32.xlu2 %v2434_v12, %s1865_s21 }
  0xcb   : > { %1270 = vrot.lane.b32.xlu0 %v1239_v45, %s1868_s24 }
  0xcc   : > { %1147 = vrot.lane.b32.xlu1 %v2337_v40, %s1865_s21  ;;  %v1045_v23 = vpop.permute.xlu2 %1044 }
  0xcd   : > { %v2593_v11 = vsel %vm1321_vm7, %v1296_v58, %v1045_v23  ;;  %v1293_v23 = vsel %vm1272_vm6, %v2476_v49, %v963_v62  ;;  %v1290_v62 = vsel %vm1272_vm6, %v2496_v53, %v2464_v5 }
  0xce   : > { %v977_v35 = vpop.permute.xlu1 %976 }
  0xd2   : > { %1217 = vrot.lane.b32.xlu2 %v3032_v32, %s1869_s25 }
  0xd3   : > { %1128 = vrot.lane.b32.xlu0 %v2302_v16, %s1866_s22  ;;  %v975_v56 = vpop.permute.xlu0 %974 }
  0xd4   : > { %1198 = vrot.lane.b32.xlu1 %v2487_v55, %s1867_s23  ;;  %v1051_v60 = vpop.permute.xlu2 %1050  ;;  %v1314_v55 = vsel %vm1272_vm6, %v2614_v31, %v977_v35 }
  0xd5   : > { %v2608_v9 = vsel %vm1321_vm7, %v1305_v26, %v1051_v60  ;;  %v1833_v26 = vld [vmem:[%s1904_s17 + $0xa8] sm:$0xff] }
  0xd6   : > { %v1031_v38 = vpop.permute.xlu1 %1030 }
  0xd7   : > { %v1323_v32 = vsel %vm1321_vm7, %v1275_v39, %v1031_v38 }
  0xda   : > { %1268 = vrot.lane.b32.xlu2 %v1134_v7, %s1868_s24 }
  0xdb   : > { %1182 = vrot.lane.b32.xlu0 %v2521_v30, %s1867_s23 }
  0xdc   : > { %1252 = vrot.lane.b32.xlu1 %v2405_v3, %s1868_s24  ;;  %v1057_v13 = vpop.permute.xlu2 %1056  ;;  %v3035_v3 = vld [vmem:[#allocation10_spill] sm:$0xff] }
  0xdd   : > { %v981_v1 = vpop.permute.xlu0 %980  ;;  %v2624_v43 = vsel %vm1321_vm7, %v1314_v55, %v1057_v13  ;;  %v2669_v55 = vld [vmem:[%s1904_s17 + $0x90] sm:$0xff]  ;;  %v1299_v13 = vsel %vm1272_vm6, %v2521_v30, %v2484_v41 }
  0xde   : > { %v2631_v7 = vsel %vm1272_vm6, %v2565_v10, %v981_v1  ;;  %v1037_v33 = vpop.permute.xlu1 %1036 }
  0xdf   : > { %v1329_v50 = vsel %vm1321_vm7, %v1284_v51, %v1037_v33 }
  0xe2   : > { %1126 = vrot.lane.b32.xlu2 %v2219_v46, %s1866_s22 }
  0xe3   : > { %1233 = vrot.lane.b32.xlu0 %v2525_v19, %s1869_s25 }
  0xe4   : > { %1110 = vrot.lane.b32.xlu1 %v3035_v3, %s1866_s22  ;;  %v1066_v22 = vpop.permute.xlu2 %1065 }
  0xe5   : > { %v1035_v45 = vpop.permute.xlu0 %1034  ;;  %v2644_v58 = vsel %vm1354_vm8, %v1323_v32, %v1066_v22 }
  0xe6   : > { %v1327_v35 = vsel %vm1321_vm7, %v1281_v48, %v1035_v45  ;;  %v1043_v17 = vpop.permute.xlu1 %1042 }
  0xe7   : > { %v2650_v19 = vsel %vm1321_vm7, %v1293_v23, %v1043_v17  ;;  %v3036_v17 = vld [vmem:[#allocation4_spill] sm:$0xff] }
  0xea   : > { %1180 = vrot.lane.b32.xlu2 %v2470_v44, %s1867_s23 }
  0xeb   : > { %1091 = vrot.lane.b32.xlu0 %v1833_v26, %s1864_s20 }
  0xec   : > { %1161 = vrot.lane.b32.xlu1 %v2432_v20, %s1865_s21  ;;  %v1072_v54 = vpop.permute.xlu2 %1071 }
  0xed   : > { %v1041_v60 = vpop.permute.xlu0 %1040  ;;  %v2662_v39 = vsel %vm1354_vm8, %v1329_v50, %v1072_v54  ;;  %v2689_v50 = vld [vmem:[%s1904_s17 + $0x84] sm:$0xff] }
  0xee   : > { %v1333_v38 = vsel %vm1321_vm7, %v1290_v62, %v1041_v60  ;;  %v1049_v32 = vpop.permute.xlu1 %1048  ;;  %v1308_v30 = vsel %vm1272_vm6, %v2689_v50, %v2523_v59 }
  0xef   : > { %v2666_v44 = vsel %vm1321_vm7, %v1302_v8, %v1049_v32  ;;  %v1311_v8 = vsel %vm1272_vm6, %v2669_v55, %v975_v56 }
  0xf2   : > { %1231 = vrot.lane.b32.xlu2 %v2302_v16, %s1869_s25 }
  0xf3   : > { %1145 = vrot.lane.b32.xlu0 %v2341_v36, %s1865_s21 }
  0xf4   : > { %1215 = vrot.lane.b32.xlu1 %v3033_v4, %s1869_s25  ;;  %v2677_v5 = vpop.permute.xlu2 %1077 }
  0xf5   : > { %v1047_v1 = vpop.permute.xlu0 %1046 }
  0xf6   : > { %v1339_v51 = vsel %vm1321_vm7, %v1299_v13, %v1047_v1  ;;  %v1055_v33 = vpop.permute.xlu1 %1054 }
  0xf7   : > { %v2686_v16 = vsel %vm1321_vm7, %v1311_v8, %v1055_v33 }
  0xfa   : > { %1089 = vrot.lane.b32.xlu2 %v2614_v31, %s1864_s20 }
  0xfb   : > { %1196 = vrot.lane.b32.xlu0 %v2565_v10, %s1867_s23  ;;  %v1317_v10 = vsel %vm1272_vm6, %v1833_v26, %v2544_v21 }
  0xfc   : > { %1266 = vrot.lane.b32.xlu1 %v2434_v12, %s1868_s24  ;;  %v2697_v41 = vpop.permute.xlu2 %1095 }
  0xfd   : > { %v1053_v4 = vpop.permute.xlu0 %1052 }
  0xfe   : > { %v2703_v56 = vsel %vm1321_vm7, %v1308_v30, %v1053_v4  ;;  %v1061_v22 = vpop.permute.xlu1 %1060 }
 0x102   : > { %1143 = vrot.lane.b32.xlu2 %v2370_v29, %s1865_s21 }
 0x103   : > { %1250 = vrot.lane.b32.xlu0 %v2337_v40, %s1868_s24 }
 0x104   : > { %1124 = vrot.lane.b32.xlu1 %v2238_v27, %s1866_s22  ;;  %v1150_v12 = vpop.permute.xlu2 %1149 }
 0x105   : > { %v1059_v48 = vpop.permute.xlu0 %1058 }
 0x106   : > { %v2714_v59 = vsel %vm1321_vm7, %v1317_v10, %v1059_v48  ;;  %v1070_v45 = vpop.permute.xlu1 %1069 }
 0x107   : > { %v2717_v23 = vsel %vm1354_vm8, %v1327_v35, %v1070_v45 }
 0x10a   : > { %1194 = vrot.lane.b32.xlu2 %v1833_v26, %s1867_s23 }
 0x10b   : > { %1108 = vrot.lane.b32.xlu0 %v3036_v17, %s1866_s22 }
 0x10c   : > { %1178 = vrot.lane.b32.xlu1 %v2476_v49, %s1867_s23  ;;  %v1201_v40 = vpop.permute.xlu2 %1200 }
 0x10d   : > { %v1068_v54 = vpop.permute.xlu0 %1067 }
 0x10e   : > { %v2726_v21 = vsel %vm1354_vm8, %v2561_v2, %v1068_v54  ;;  %v1076_v62 = vpop.permute.xlu1 %1075 }
 0x10f   : > { %v2729_v60 = vsel %vm1354_vm8, %v1333_v38, %v1076_v62  ;;  %v3037_v38 = vld [vmem:[#allocation2_spill] sm:$0xff]  ;;  %v3039_v62 = vld [vmem:[#allocation5_spill] sm:$0xff] }
 0x112   : > { %1248 = vrot.lane.b32.xlu2 %v2341_v36, %s1868_s24 }
 0x113   : > { %1159 = vrot.lane.b32.xlu0 %v2402_v47, %s1865_s21 }
 0x114   : > { %1229 = vrot.lane.b32.xlu1 %v2219_v46, %s1869_s25  ;;  %v1255_v49 = vpop.permute.xlu2 %1254 }
 0x115   : > { %v1074_v35 = vpop.permute.xlu0 %1073 }
 0x116   : > { %v2739_v26 = vsel %vm1354_vm8, %v2581_v52, %v1074_v35  ;;  %v1082_v2 = vpop.permute.xlu1 %1081 }
 0x117   : > { %v2742_v32 = vsel %vm1354_vm8, %v1339_v51, %v1082_v2 }
 0x11a   : > { %1106 = vrot.lane.b32.xlu2 %v3037_v38, %s1866_s22 }
 0x11b   : > { %1213 = vrot.lane.b32.xlu0 %v3035_v3, %s1869_s25 }
 0x11c   : > { %1087 = vrot.lane.b32.xlu1 %v2669_v55, %s1864_s20  ;;  %v1113_v46 = vpop.permute.xlu2 %1112 }
 0x11d   : > { %v1080_v36 = vpop.permute.xlu0 %1079 }
 0x11e   : > { %v1131_v13 = vpop.permute.xlu1 %1130  ;;  %v1370_v33 = vsel %vm1354_vm8, %v2593_v11, %v1080_v36 }
 0x122   : > { %1157 = vrot.lane.b32.xlu2 %v2410_v25, %s1865_s21 }
 0x123   : > { %1264 = vrot.lane.b32.xlu0 %v2432_v20, %s1868_s24 }
 0x124   : > { %1141 = vrot.lane.b32.xlu1 %v2300_v61, %s1865_s21  ;;  %v2756_v52 = vpop.permute.xlu2 %1163 }
 0x125   : > { %v1115_v1 = vpop.permute.xlu0 %1114 }
 0x126   : > { %v1185_v8 = vpop.permute.xlu1 %1184  ;;  %v1403_v30 = vsel %vm1387_vm9, %v1370_v33, %v1115_v1 }
 0x127   : > { %v1436_v4 = vsel %vm1420_vm10, %v1403_v30, %v1150_v12 }
 0x128   : > { %v1469_v10 = vsel %vm1453_vm11, %v1436_v4, %v1185_v8  ;;  %v1368_v8 = vsel %vm1354_vm8, %v2650_v19, %v2677_v5 }
 0x12a   : > { %1211 = vrot.lane.b32.xlu2 %v3036_v17, %s1869_s25 }
 0x12b   : > { %1122 = vrot.lane.b32.xlu0 %v2267_v28, %s1866_s22 }
 0x12c   : > { %1192 = vrot.lane.b32.xlu1 %v2614_v31, %s1867_s23  ;;  %v1218_v3 = vpop.permute.xlu2 %1217  ;;  %v1353_v31 = vsel %vm1321_vm7, %v2631_v7, %v1061_v22 }
 0x12d   : > { %v1166_v51 = vpop.permute.xlu0 %1165 }
 0x12e   : > { %v1236_v20 = vpop.permute.xlu1 %1235 }
 0x132   : > { %1262 = vrot.lane.b32.xlu2 %v2402_v47, %s1868_s24 }
 0x133   : > { %1176 = vrot.lane.b32.xlu0 %v2496_v53, %s1867_s23  ;;  %v1386_v53 = vsel %vm1354_vm8, %v1353_v31, %v2697_v41 }
 0x134   : > { %1246 = vrot.lane.b32.xlu1 %v2370_v29, %s1868_s24  ;;  %v1269_v11 = vpop.permute.xlu2 %1268  ;;  %v1419_v7 = vsel %vm1387_vm9, %v1386_v53, %v1131_v13  ;;  %v3038_v29 = vld [vmem:[#allocation12_spill] sm:$0xff] }
 0x135   : > { %v1220_v48 = vpop.permute.xlu0 %1219  ;;  %v1452_v12 = vsel %vm1420_vm10, %v1419_v7, %v1166_v51 }
 0x136   : > { %v1502_v47 = vsel %vm1486_vm12, %v1469_v10, %v1220_v48  ;;  %v1094_v45 = vpop.permute.xlu1 %1093  ;;  %v1485_v54 = vsel %vm1453_vm11, %v1452_v12, %v1201_v40 }
 0x137   : > { %v1535_v17 = vsel %vm1519_vm13, %v1502_v47, %v1255_v49  ;;  %v1518_v49 = vsel %vm1486_vm12, %v1485_v54, %v1236_v20  ;;  %v1384_v19 = vsel %vm1354_vm8, %v2714_v59, %v1094_v45 }
 0x138   : > { %v1571_v22 = vsel %vm1553_vm14, %v1535_v17, 0 }
 0x139   : > { %1589 = vmatpush.bf16.xpose.msra.mxu0 %v1571_v22 }
 0x13a   : > { %1120 = vrot.lane.b32.xlu2 %v3038_v29, %s1866_s22 }
 0x13b   : > { %1227 = vrot.lane.b32.xlu0 %v2238_v27, %s1869_s25 }
 0x13c   : > { %1104 = vrot.lane.b32.xlu1 %v3039_v62, %s1866_s22  ;;  %v1127_v41 = vpop.permute.xlu2 %1126 }
 0x13d   : > { %v1271_v35 = vpop.permute.xlu0 %1270 }
 0x13e   : > { %v1551_v2 = vsel %vm1519_vm13, %v1518_v49, %v1271_v35  ;;  %v1148_v36 = vpop.permute.xlu1 %1147 }
 0x13f   : > { %v1587_v13 = vsel %vm1553_vm14, %v1551_v2, 0 }
 0x140   : > { %1602 = vmatpush.bf16.xpose.msra.mxu1 %v1587_v13 }
 0x142   : > { %1174 = vrot.lane.b32.xlu2 %v2451_v14, %s1867_s23  ;;  %v1401_v14 = vsel %vm1387_vm9, %v1368_v8, %v1113_v46 }
 0x143   : > { %1085 = vrot.lane.b32.xlu0 %v2689_v50, %s1864_s20  ;;  %v1434_v20 = vsel %vm1420_vm10, %v1401_v14, %v1148_v36 }
 0x144   : > { %1155 = vrot.lane.b32.xlu1 %v2421_v18, %s1865_s21  ;;  %v1181_v27 = vpop.permute.xlu2 %1180 }
 0x145   : > { %v1129_v40 = vpop.permute.xlu0 %1128 }
 0x146   : > { %v1199_v1 = vpop.permute.xlu1 %1198  ;;  %v1417_v4 = vsel %vm1387_vm9, %v1384_v19, %v1129_v40  ;;  %v3042_v40 = vld [vmem:[#allocation6_spill] sm:$0xff] }
 0x14a   : > { %1225 = vrot.lane.b32.xlu2 %v2267_v28, %s1869_s25 }
 0x14b   : > { %1139 = vrot.lane.b32.xlu0 %v2309_v34, %s1865_s21 }
 0x14c   : > { %1209 = vrot.lane.b32.xlu1 %v3037_v38, %s1869_s25  ;;  %v1232_v51 = vpop.permute.xlu2 %1231  ;;  %v1450_v38 = vsel %vm1420_vm10, %v1417_v4, %v2756_v52 }
 0x14d   : > { %v1183_v33 = vpop.permute.xlu0 %1182 }
 0x14e   : > { %v1467_v30 = vsel %vm1453_vm11, %v1434_v20, %v1183_v33  ;;  %v1253_v31 = vpop.permute.xlu1 %1252 }
 0x14f   : > { %v1500_v28 = vsel %vm1486_vm12, %v1467_v30, %v1218_v3  ;;  %v1483_v3 = vsel %vm1453_vm11, %v1450_v38, %v1199_v1 }
 0x150   : > { %v1533_v5 = vsel %vm1519_vm13, %v1500_v28, %v1253_v31 }
 0x151   : > { %v1569_v46 = vsel %vm1553_vm14, %v1533_v5, 0 }
 0x152   : > { %1590 = vmatpush.bf16.xpose.msra.mxu0 %v1569_v46  ;;  %1083 = vrot.lane.b32.xlu2 %v2596_v0, %s1864_s20 }
 0x153   : > { %1190 = vrot.lane.b32.xlu0 %v2669_v55, %s1867_s23 }
 0x154   : > { %1260 = vrot.lane.b32.xlu1 %v2410_v25, %s1868_s24  ;;  %v2826_v59 = vpop.permute.xlu2 %1089  ;;  %v3040_v25 = vld [vmem:[#allocation15_spill] sm:$0xff] }
 0x155   : > { %v1234_v10 = vpop.permute.xlu0 %1233  ;;  %v1380_v19 = vsel %vm1354_vm8, %v2686_v16, %v2826_v59 }
 0x156   : > { %v1516_v48 = vsel %vm1486_vm12, %v1483_v3, %v1234_v10  ;;  %v1111_v47 = vpop.permute.xlu1 %1110 }
 0x157   : > { %v1549_v45 = vsel %vm1519_vm13, %v1516_v48, %v1269_v11  ;;  %v3041_v11 = vld [vmem:[#allocation3_spill] sm:$0xff] }
 0x158   : > { %v1585_v53 = vsel %vm1553_vm14, %v1549_v45, 0 }
 0x159   : > { %1603 = vmatpush.bf16.xpose.msra.mxu1 %v1585_v53 }
 0x15a   : > { %1137 = vrot.lane.b32.xlu2 %v2325_v57, %s1865_s21 }
 0x15b   : > { %1244 = vrot.lane.b32.xlu0 %v2300_v61, %s1868_s24 }
 0x15c   : > { %1118 = vrot.lane.b32.xlu1 %v3040_v25, %s1866_s22  ;;  %v1144_v52 = vpop.permute.xlu2 %1143 }
 0x15d   : > { %v1092_v55 = vpop.permute.xlu0 %1091 }
 0x15e   : > { %v1162_v17 = vpop.permute.xlu1 %1161  ;;  %v1382_v61 = vsel %vm1354_vm8, %v2624_v43, %v1092_v55  ;;  %v1399_v43 = vsel %vm1387_vm9, %v2729_v60, %v1111_v47 }
 0x162   : > { %1188 = vrot.lane.b32.xlu2 %v2689_v50, %s1867_s23  ;;  %v1415_v50 = vsel %vm1387_vm9, %v1382_v61, %v1127_v41 }
 0x163   : > { %1102 = vrot.lane.b32.xlu0 %v3041_v11, %s1866_s22  ;;  %v1448_v54 = vsel %vm1420_vm10, %v1415_v50, %v1162_v17 }
 0x164   : > { %1172 = vrot.lane.b32.xlu1 %v2454_v6, %s1867_s23  ;;  %v1195_v12 = vpop.permute.xlu2 %1194 }
 0x165   : > { %v1146_v7 = vpop.permute.xlu0 %1145 }
 0x166   : > { %v1216_v22 = vpop.permute.xlu1 %1215  ;;  %v1432_v36 = vsel %vm1420_vm10, %v1399_v43, %v1146_v7 }
 0x16a   : > { %1242 = vrot.lane.b32.xlu2 %v2309_v34, %s1868_s24 }
 0x16b   : > { %1153 = vrot.lane.b32.xlu0 %v2363_v37, %s1865_s21 }
 0x16c   : > { %1223 = vrot.lane.b32.xlu1 %v3038_v29, %s1869_s25  ;;  %v1249_v13 = vpop.permute.xlu2 %1248  ;;  %v1465_v29 = vsel %vm1453_vm11, %v1432_v36, %v1181_v27 }
 0x16d   : > { %v1197_v6 = vpop.permute.xlu0 %1196  ;;  %v1498_v60 = vsel %vm1486_vm12, %v1465_v29, %v1216_v22 }
 0x16e   : > { %v1481_v49 = vsel %vm1453_vm11, %v1448_v54, %v1197_v6  ;;  %v1267_v35 = vpop.permute.xlu1 %1266 }
 0x16f   : > { %v1514_v2 = vsel %vm1486_vm12, %v1481_v49, %v1232_v51 }
 0x170   : > { %v1547_v34 = vsel %vm1519_vm13, %v1514_v2, %v1267_v35 }
 0x171   : > { %v1583_v41 = vsel %vm1553_vm14, %v1547_v34, 0 }
 0x172   : > { %1604 = vmatpush.bf16.xpose.msra.mxu1 %v1583_v41  ;;  %1116 = vrot.lane.b32.xlu2 %v3034_v15, %s1866_s22 }
 0x173   : > { %1207 = vrot.lane.b32.xlu0 %v3039_v62, %s1869_s25 }
 0x174   : > { %1100 = vrot.lane.b32.xlu1 %v3042_v40, %s1866_s22  ;;  %v1107_v15 = vpop.permute.xlu2 %1106 }
 0x175   : > { %v1251_v1 = vpop.permute.xlu0 %1250  ;;  %v1395_v53 = vsel %vm1387_vm9, %v2662_v39, %v1107_v15 }
 0x176   : > { %v1531_v8 = vsel %vm1519_vm13, %v1498_v60, %v1251_v1  ;;  %v1125_v14 = vpop.permute.xlu1 %1124 }
 0x177   : > { %v1567_v51 = vsel %vm1553_vm14, %v1531_v8, 0  ;;  %v1413_v5 = vsel %vm1387_vm9, %v1380_v19, %v1125_v14 }
 0x178   : > { %1591 = vmatpush.bf16.xpose.msra.mxu0 %v1567_v51 }
 0x17a   : > { %1170 = vrot.lane.b32.xlu2 %v2473_v42, %s1867_s23 }
 0x17b   : > { %1258 = vrot.lane.b32.xlu0 %v2421_v18, %s1868_s24 }
 0x17c   : > { %1151 = vrot.lane.b32.xlu1 %v2379_v63, %s1865_s21  ;;  %v1158_v42 = vpop.permute.xlu2 %1157 }
 0x17d   : > { %v1109_v62 = vpop.permute.xlu0 %1108 }
 0x17e   : > { %v1179_v27 = vpop.permute.xlu1 %1178  ;;  %v1397_v18 = vsel %vm1387_vm9, %v2739_v26, %v1109_v62 }
 0x17f   : > { %v1430_v63 = vsel %vm1420_vm10, %v1397_v18, %v1144_v52 }
 0x180   : > { %v1463_v30 = vsel %vm1453_vm11, %v1430_v63, %v1179_v27 }
 0x182   : > { %1221 = vrot.lane.b32.xlu2 %v3040_v25, %s1869_s25 }
 0x183   : > { %1135 = vrot.lane.b32.xlu0 %v2269_v24, %s1865_s21 }
 0x184   : > { %1205 = vrot.lane.b32.xlu1 %v3041_v11, %s1869_s25 }
 0x185   : > { %v1160_v20 = vpop.permute.xlu0 %1159 }
 0x186   : > { %v1230_v33 = vpop.permute.xlu1 %1229  ;;  %v1446_v46 = vsel %vm1420_vm10, %v1413_v5, %v1160_v20 }
 0x18b   : > { %1186 = vrot.lane.b32.xlu0 %v2596_v0, %s1867_s23  ;;  %v1212_v0 = vpop.permute.xlu2 %1211 }
 0x18c   : > { %1256 = vrot.lane.b32.xlu1 %v2363_v37, %s1868_s24  ;;  %v1479_v37 = vsel %vm1453_vm11, %v1446_v46, %v1195_v12 }
 0x18d   : > { %v1214_v24 = vpop.permute.xlu0 %1213  ;;  %v1512_v38 = vsel %vm1486_vm12, %v1479_v37, %v1230_v33 }
 0x18e   : > { %v1496_v31 = vsel %vm1486_vm12, %v1463_v30, %v1214_v24  ;;  %v1088_v28 = vpop.permute.xlu1 %1087 }
 0x18f   : > { %v1529_v26 = vsel %vm1519_vm13, %v1496_v31, %v1249_v13  ;;  %v1378_v7 = vsel %vm1354_vm8, %v2703_v56, %v1088_v28 }
 0x190   : > { %v1565_v4 = vsel %vm1553_vm14, %v1529_v26, 0 }
 0x191   : > { %1592 = vmatpush.bf16.xpose.msra.mxu0 %v1565_v4 }
 0x193   : > { %1240 = vrot.lane.b32.xlu0 %v2325_v57, %s1868_s24  ;;  %v1263_v48 = vpop.permute.xlu2 %1262 }
 0x195   : > { %v1265_v3 = vpop.permute.xlu0 %1264 }
 0x196   : > { %v1545_v16 = vsel %vm1519_vm13, %v1512_v38, %v1265_v3  ;;  %v1142_v59 = vpop.permute.xlu1 %1141 }
 0x197   : > { %v1581_v10 = vsel %vm1553_vm14, %v1545_v16, 0  ;;  %v1428_v57 = vsel %vm1420_vm10, %v1395_v53, %v1142_v59 }
 0x198   : > { %1605 = vmatpush.bf16.xpose.msra.mxu1 %v1581_v10 }
 0x19b   : > { %v1121_v25 = vpop.permute.xlu2 %1120 }
 0x19d   : > { %v1123_v47 = vpop.permute.xlu0 %1122 }
 0x19e   : > { %v1193_v45 = vpop.permute.xlu1 %1192  ;;  %v1411_v12 = vsel %vm1387_vm9, %v1378_v7, %v1123_v47 }
 0x19f   : > { %v1444_v39 = vsel %vm1420_vm10, %v1411_v12, %v1158_v42 }
 0x1a0   : > { %v1477_v50 = vsel %vm1453_vm11, %v1444_v39, %v1193_v45 }
 0x1a3   : > { %v1175_v6 = vpop.permute.xlu2 %1174 }
 0x1a5   : > { %v1177_v55 = vpop.permute.xlu0 %1176 }
 0x1a6   : > { %v1461_v52 = vsel %vm1453_vm11, %v1428_v57, %v1177_v55  ;;  %v1247_v17 = vpop.permute.xlu1 %1246 }
 0x1a7   : > { %v1494_v11 = vsel %vm1486_vm12, %v1461_v52, %v1212_v0 }
 0x1a8   : > { %v1527_v22 = vsel %vm1519_vm13, %v1494_v11, %v1247_v17 }
 0x1a9   : > { %v1563_v61 = vsel %vm1553_vm14, %v1527_v22, 0 }
 0x1aa   : > { %1593 = vmatpush.bf16.xpose.msra.mxu0 %v1563_v61 }
 0x1ab   : > { %v1226_v36 = vpop.permute.xlu2 %1225 }
 0x1ad   : > { %v1228_v54 = vpop.permute.xlu0 %1227 }
 0x1ae   : > { %v1510_v49 = vsel %vm1486_vm12, %v1477_v50, %v1228_v54  ;;  %v1105_v35 = vpop.permute.xlu1 %1104 }
 0x1af   : > { %v1543_v2 = vsel %vm1519_vm13, %v1510_v49, %v1263_v48  ;;  %v1393_v62 = vsel %vm1387_vm9, %v2717_v23, %v1105_v35 }
 0x1b0   : > { %v1579_v56 = vsel %vm1553_vm14, %v1543_v2, 0 }
 0x1b1   : > { %1606 = vmatpush.bf16.xpose.msra.mxu1 %v1579_v56 }
 0x1b3   : > { %v1084_v40 = vpop.permute.xlu2 %1083 }
 0x1b4   : > { %v1374_v59 = vsel %vm1354_vm8, %v2666_v44, %v1084_v40 }
 0x1b5   : > { %v1086_v43 = vpop.permute.xlu0 %1085 }
 0x1b6   : > { %v1156_v34 = vpop.permute.xlu1 %1155  ;;  %v1376_v29 = vsel %vm1354_vm8, %v2608_v9, %v1086_v43 }
 0x1b7   : > { %v1409_v60 = vsel %vm1387_vm9, %v1376_v29, %v1121_v25 }
 0x1b8   : > { %v1442_v1 = vsel %vm1420_vm10, %v1409_v60, %v1156_v34 }
 0x1bb   : > { %v1138_v42 = vpop.permute.xlu2 %1137 }
 0x1bd   : > { %v1140_v41 = vpop.permute.xlu0 %1139 }
 0x1be   : > { %v1210_v13 = vpop.permute.xlu1 %1209  ;;  %v1426_v20 = vsel %vm1420_vm10, %v1393_v62, %v1140_v41  ;;  %v1552_v41 = vld [vmem:[%s2981_s1] sm:$0xf] }
 0x1bf   : > { %v1459_v33 = vsel %vm1453_vm11, %v1426_v20, %v1175_v6 }
 0x1c0   : > { %v1492_v18 = vsel %vm1486_vm12, %v1459_v33, %v1210_v13 }
 0x1c3   : > { %v1189_v28 = vpop.permute.xlu2 %1188 }
 0x1c5   : > { %v1191_v8 = vpop.permute.xlu0 %1190 }
 0x1c6   : > { %v1475_v14 = vsel %vm1453_vm11, %v1442_v1, %v1191_v8  ;;  %v1261_v51 = vpop.permute.xlu1 %1260 }
 0x1c7   : > { %v1508_v15 = vsel %vm1486_vm12, %v1475_v14, %v1226_v36 }
 0x1c8   : > { %v1541_v27 = vsel %vm1519_vm13, %v1508_v15, %v1261_v51 }
 0x1c9   : > { %v1577_v9 = vsel %vm1553_vm14, %v1541_v27, 0 }
 0x1ca   : > { %1607 = vmatpush.bf16.xpose.msra.mxu1 %v1577_v9 }
 0x1cb   : > { %v1243_v0 = vpop.permute.xlu2 %1242 }
 0x1cd   : > { %v1245_v63 = vpop.permute.xlu0 %1244 }
 0x1ce   : > { %v1525_v30 = vsel %vm1519_vm13, %v1492_v18, %v1245_v63  ;;  %v1119_v24 = vpop.permute.xlu1 %1118 }
 0x1cf   : > { %v1561_v31 = vsel %vm1553_vm14, %v1525_v30, 0  ;;  %v1407_v48 = vsel %vm1387_vm9, %v1374_v59, %v1119_v24 }
 0x1d0   : > { %1594 = vmatpush.bf16.xpose.msra.mxu0 %v1561_v31 }
 0x1d5   : > { %v1103_v23 = vpop.permute.xlu0 %1102 }
 0x1d6   : > { %v1173_v19 = vpop.permute.xlu1 %1172  ;;  %v1391_v4 = vsel %vm1387_vm9, %v2726_v21, %v1103_v23  ;;  %v1117_v21 = vpop.permute.xlu2 %1116 }
 0x1d7   : > { %v1424_v46 = vsel %vm1420_vm10, %v1391_v4, %v1138_v42  ;;  %v1405_v22 = vsel %vm1387_vm9, %v2742_v32, %v1117_v21 }
 0x1d8   : > { %v1457_v37 = vsel %vm1453_vm11, %v1424_v46, %v1173_v19 }
 0x1dd   : > { %v1154_v26 = vpop.permute.xlu0 %1153 }
 0x1de   : > { %v1224_v5 = vpop.permute.xlu1 %1223  ;;  %v1440_v45 = vsel %vm1420_vm10, %v1407_v48, %v1154_v26  ;;  %v1171_v17 = vpop.permute.xlu2 %1170 }
 0x1df   : > { %v1473_v53 = vsel %vm1453_vm11, %v1440_v45, %v1189_v28 }
 0x1e0   : > { %v1506_v25 = vsel %vm1486_vm12, %v1473_v53, %v1224_v5 }
 0x1e5   : > { %v1208_v38 = vpop.permute.xlu0 %1207 }
 0x1e6   : > { %v1490_v3 = vsel %vm1486_vm12, %v1457_v37, %v1208_v38  ;;  %v1101_v16 = vpop.permute.xlu1 %1100  ;;  %v1222_v12 = vpop.permute.xlu2 %1221 }
 0x1e7   : > { %v1523_v10 = vsel %vm1519_vm13, %v1490_v3, %v1243_v0  ;;  %v1389_v49 = vsel %vm1387_vm9, %v2644_v58, %v1101_v16 }
 0x1e8   : > { %v1559_v47 = vsel %vm1553_vm14, %v1523_v10, 0 }
 0x1e9   : > { %1595 = vmatpush.bf16.xpose.msra.mxu0 %v1559_v47 }
 0x1ed   : > { %v1259_v57 = vpop.permute.xlu0 %1258 }
 0x1ee   : > { %v1539_v55 = vsel %vm1519_vm13, %v1506_v25, %v1259_v57  ;;  %v1152_v52 = vpop.permute.xlu1 %1151 }
 0x1ef   : > { %v1575_v44 = vsel %vm1553_vm14, %v1539_v55, 0  ;;  %v1438_v61 = vsel %vm1420_vm10, %v1405_v22, %v1152_v52 }
 0x1f0   : > { %1608 = vmatpush.bf16.xpose.msra.mxu1 %v1575_v44 }
 0x1f5   : > { %v1136_v11 = vpop.permute.xlu0 %1135 }
 0x1f6   : > { %v1206_v7 = vpop.permute.xlu1 %1205  ;;  %v1422_v2 = vsel %vm1420_vm10, %v1389_v49, %v1136_v11 }
 0x1f7   : > { %v1455_v32 = vsel %vm1453_vm11, %v1422_v2, %v1171_v17 }
 0x1f8   : > { %v1488_v43 = vsel %vm1486_vm12, %v1455_v32, %v1206_v7 }
 0x1fd   : > { %v1187_v39 = vpop.permute.xlu0 %1186 }
 0x1fe   : > { %v1471_v50 = vsel %vm1453_vm11, %v1438_v61, %v1187_v39  ;;  %v1257_v54 = vpop.permute.xlu1 %1256 }
 0x1ff   : > { %v1504_v6 = vsel %vm1486_vm12, %v1471_v50, %v1222_v12 }
 0x200   : > { %v1537_v35 = vsel %vm1519_vm13, %v1504_v6, %v1257_v54 }
 0x201   : > { %v1573_v56 = vsel %vm1553_vm14, %v1537_v35, 0 }
 0x202   : > { %1609 = vmatpush.bf16.xpose.msra.mxu1 %v1573_v56 }
 0x205   : > { %v1241_v34 = vpop.permute.xlu0 %1240 }
 0x206   : > { %v1521_v36 = vsel %vm1519_vm13, %v1488_v43, %v1241_v34 }
 0x207   : > { %v1557_v58 = vsel %vm1553_vm14, %v1521_v36, 0 }
 0x208   : > { %1596 = vmatpush.bf16.xpose.msra.mxu0 %v1557_v58 }
 0x209   : > { %1815 = vmatmul.msk.bf16.vlgmr.msra.gmra.mxu1 %vm1553_vm14, %v1552_v41 }
 0x20f   : > { %1814 = vmatmul.msk.bf16.vlgmr.msra.gmra.mxu0 %vm1553_vm14, %v1552_v41 }
 0x286   : > { %v1611_v13 = vpop.f32.mrf.mxu1 }
 0x287   : > { %1628 = vst [vmem:[%s177_s4 + $0x8] sm:$0xff] %v1611_v13  ;;  %v1619_v29 = vmul.f32 %v1611_v13, %v1611_v13 }
 0x28c   : > { %v1598_v40 = vpop.f32.mrf.mxu0 }
 0x28d   : > { %1627 = vst [vmem:[%s177_s4] sm:$0xff] %v1598_v40  ;;  %v1615_v60 = vadd.f32 %v1611_v13, %v1598_v40  ;;  %v1618_v1 = vmul.f32 %v1598_v40, %v1598_v40 }
 0x28e   : > { %v1613_v8 = vpop.f32.mrf.mxu1 }
 0x28f   : > { %1616 = vadd.xlane.f32.xlu2 %v1615_v60  ;;  %v1620_v14 = vadd.f32 %v1619_v29, %v1618_v1 }
 0x291   : > { %1621 = vadd.xlane.f32.xlu0 %v1620_v14 }
 0x294   : > { %v1600_v51 = vpop.f32.mrf.mxu0 }
 0x302   : > { %v1617_v15 = vpop.xlane.xlu2 %1616 }
 0x304   : > { %v1622_v62 = vpop.xlane.xlu0 %1621 }
 0x305   : > { %v1624_v27 = vsel %vm1623_vm15, %v1617_v15, %v1622_v62 }
 0x306   : > { %1626 = vst.msk [vmem:[%s181_s8] sm:$0xff] %vm1625_vm0, %v1624_v27 }
 0x307 PF: > { %s14_s12 = sadd.s32 1, %s1860_s12  }
 0x308   : > { %p11_p4 = scmp.ge.s32.totalorder %s14_s12, 4  }
 0x30a   :  { %13 = sbr.rel (!%p11_p4) target bundleno = 1 (0x1), region = 70 }

</bundles_post_ra>
